<compile_context>
chip_gen: v7x
topology: tpu7x:2x2x1
jax: 0.10.0
libtpu: 0.0.40
codegen_flags: <defaults>
</compile_context>

<pallas_src>
import functools
import math

import jax
import jax.numpy as jnp
from jax.experimental import pallas as pl
from jax.experimental.pallas import tpu as pltpu


def _layernorm(v, gamma, beta, eps=1e-5):
    mu = jnp.mean(v, axis=-1, keepdims=True)
    var = jnp.mean((v - mu) ** 2, axis=-1, keepdims=True)
    return (v - mu) * jax.lax.rsqrt(var + eps) * gamma + beta


def transformer_block_kernel(
    x_ref, mask_ref,
    wqkv_ref, bqkv_ref, wo_ref, bo_ref,
    ln1_g_ref, ln1_b_ref,
    w1_ref, b1_ref, w2_ref, b2_ref,
    ln2_g_ref, ln2_b_ref,
    out_ref,
    ctx_ref,                 # VMEM scratch: (bt*S, D) f32 lane-dense context slab
    *, n_head: int, compute_dtype,
):
    """One transformer block (MHA + FFN + 2 layernorms) for bt batch rows."""
    bt, S, D = x_ref.shape
    H = n_head
    dh = D // H
    cdt = compute_dtype
    f32 = jnp.float32

    x = x_ref[...].astype(f32).reshape(bt * S, D)                 # (bt*S, D)
    neg = (mask_ref[...].astype(f32) - 1.0) * 1e9                 # (bt, 1, S)

    # ---- fused QKV projection: one lane-dense MXU matmul ----
    # 1/sqrt(dh) is pre-folded into the Q columns of wqkv/bqkv (host prep).
    qkv = jnp.dot(x.astype(cdt), wqkv_ref[...],
                  preferred_element_type=f32) + bqkv_ref[...]     # (bt*S, 3D) f32
    qkv_c = qkv.astype(cdt)

    # ---- attention scores / softmax / context (per batch row, per head) ----
    # Heads are lane-concatenated into an (S, D) slab and written in place into
    # the VMEM scratch; the output projection is then ONE (bt*S, D) x (D, D)
    # MXU matmul with the original Wo (K = D; no per-head small-K matmuls).
    for b in range(bt):                                           # static, small
        row = qkv_c[b * S:(b + 1) * S]                            # (S, 3D)
        q = row[:, :D]
        k = row[:, D:2 * D]
        v = row[:, 2 * D:]
        neg_b = neg[b]                                            # (1, S)
        ctx_heads = []
        for h in range(H):                                        # static, small
            qh = q[:, h * dh:(h + 1) * dh]
            kh = k[:, h * dh:(h + 1) * dh]
            vh = v[:, h * dh:(h + 1) * dh]
            s = jnp.dot(qh, kh.T, preferred_element_type=f32) + neg_b
            s = s - jnp.max(s, axis=-1, keepdims=True)
            p = jnp.exp(s)
            # EUP reciprocal (separate VLIW slot) instead of a VALU divide.
            p = p * pl.reciprocal(jnp.sum(p, axis=-1, keepdims=True), approx=True)
            ctx_heads.append(jnp.dot(p.astype(cdt), vh,
                                     preferred_element_type=f32))  # (S, dh) f32
        ctx_row = ctx_heads[0] if H == 1 else jnp.concatenate(ctx_heads, axis=-1)
        ctx_ref[b * S:(b + 1) * S, :] = ctx_row                    # (S, D) f32

    # ---- single fused output projection over all bt rows ----
    attn = jnp.dot(ctx_ref[...].astype(cdt), wo_ref[...],
                   preferred_element_type=f32) + bo_ref[...]       # (bt*S, D) f32
    # TODO(synk): nn.Dropout(rate) is identity at inference; training-mode
    # dropout (RNG-faithful to torch) is not implemented.

    h1 = _layernorm(x + attn, ln1_g_ref[...], ln1_b_ref[...])

    # ---- position-wise feed-forward ----
    f = jnp.dot(h1.astype(cdt), w1_ref[...], preferred_element_type=f32) + b1_ref[...]
    f = jnp.maximum(f, 0.0)
    f = jnp.dot(f.astype(cdt), w2_ref[...], preferred_element_type=f32) + b2_ref[...]
    h2 = _layernorm(h1 + f, ln2_g_ref[...], ln2_b_ref[...])

    out_ref[...] = h2.reshape(bt, S, D).astype(out_ref.dtype)


# ------------------------------ sizing helpers ------------------------------
def _physical_vmem_bytes():
    """Per-core physical VMEM reported by the runtime (fallback: 64 MiB)."""
    try:
        info = pltpu.get_tpu_info()
        for name in ("vmem_capacity_bytes", "vmem_size_bytes", "vmem_bytes"):
            v = getattr(info, name, None)
            if v:
                return int(v)
    except Exception:
        pass
    return 64 * 1024 * 1024     # conservative: v7x per-TensorCore VMEM


def _block_vmem_estimate(bt, S, D, dff, weight_bytes):
    f32 = 4
    act = bt * S * D
    io = 2 * (2 * act * f32) + 2 * bt * S * f32        # x/out double-buffered + mask
    inter = 4 * act * f32 + bt * S * 3 * D * f32 + bt * S * dff * f32
    scratch = act * f32
    # 2x weights is conservative (covers the double-buffered fallback path).
    return int(1.5 * (io + inter + scratch)) + 2 * weight_bytes


def _pick_block_b(B, S, D, dff, weight_bytes, vmem_budget):
    """Largest divisor of B that (a) leaves >= min_steps grid steps (>= 2 per
    v7x TensorCore when B allows it) and (b) fits the per-step VMEM budget."""
    divisors = [d for d in range(1, B + 1) if B % d == 0]
    min_steps = 4 if B >= 4 else (2 if B >= 2 else 1)
    for bt in sorted(divisors, reverse=True):
        if B // bt >= min_steps and \
                _block_vmem_estimate(bt, S, D, dff, weight_bytes) <= vmem_budget:
            return bt
    for bt in sorted(divisors, reverse=True):
        if _block_vmem_estimate(bt, S, D, dff, weight_bytes) <= vmem_budget:
            return bt
    return 1


# ------------------------------ host-side prep ------------------------------
def prepare_block_params(p, n_head, compute_dtype=jnp.bfloat16):
    """One-time host prep: fuse QKV (1/sqrt(dh) folded into the Q columns),
    keep Wo un-reshaped (D, D), cast matmul weights to bf16."""
    D = p["wq"].shape[0]
    dh = D // n_head
    scale = 1.0 / math.sqrt(dh)
    f32 = jnp.float32
    return dict(
        wqkv=jnp.concatenate([p["wq"] * scale, p["wk"], p["wv"]],
                             axis=1).astype(compute_dtype),
        bqkv=jnp.concatenate([p["bq"] * scale, p["bk"], p["bv"]],
                             axis=1).astype(f32),
        wo=p["wo"].astype(compute_dtype),
        bo=p["bo"].astype(f32),
        ln1_g=p["ln1_g"].astype(f32), ln1_b=p["ln1_b"].astype(f32),
        w1=p["w1"].astype(compute_dtype), b1=p["b1"].astype(f32),
        w2=p["w2"].astype(compute_dtype), b2=p["b2"].astype(f32),
        ln2_g=p["ln2_g"].astype(f32), ln2_b=p["ln2_b"].astype(f32),
    )


def transformer_block_pallas(x, mask, prepared, n_head, *, block_b=None,
                             compute_dtype=jnp.bfloat16):
    B, S, D = x.shape
    assert D % n_head == 0
    dff = prepared["w1"].shape[1]

    weight_names = ("wqkv", "bqkv", "wo", "bo", "ln1_g", "ln1_b",
                    "w1", "b1", "w2", "b2", "ln2_g", "ln2_b")
    weights = tuple(prepared[n] for n in weight_names)
    weight_bytes = sum(int(w.size) * w.dtype.itemsize for w in weights)

    # Generation-aware VMEM budget: ~80% of physical VMEM
    # (~100 MiB on v5e/v6e's 128 MiB, ~51 MiB on v7x's 64 MiB), clamped.
    phys = _physical_vmem_bytes()
    vmem_limit = int(min(max(int(0.80 * phys), 32 * 1024 * 1024),
                         112 * 1024 * 1024))

    bt = _pick_block_b(B, S, D, dff, weight_bytes, vmem_limit) \
        if block_b is None else block_b
    assert B % bt == 0
    grid = (B // bt,)

    kernel = functools.partial(transformer_block_kernel, n_head=n_head,
                               compute_dtype=compute_dtype)
    operands = (x, mask) + weights

    # Advisory cost hint for the XLA scheduler.
    flops = 2 * B * S * D * (3 * D + 2 * S + D + 2 * dff)
    transcendentals = B * n_head * S * (S + 1)
    bytes_accessed = int(2 * x.nbytes + mask.nbytes + weight_bytes)
    cost = pl.CostEstimate(flops=int(flops), transcendentals=int(transcendentals),
                           bytes_accessed=bytes_accessed)

    def weight_spec(shape, single_buffer):
        zeros = (0,) * len(shape)
        idx = lambda b, _z=zeros: _z
        if single_buffer:
            # Constant index_map across the grid -> no need to double buffer.
            return pl.BlockSpec(shape, idx, pipeline_mode=pl.Buffered(1))
        return pl.BlockSpec(shape, idx)

    def build(single_buffer_weights):
        ws = lambda shape: weight_spec(shape, single_buffer_weights)
        in_specs = [
            pl.BlockSpec((bt, S, D), lambda b: (b, 0, 0)),    # x
            pl.BlockSpec((bt, 1, S), lambda b: (b, 0, 0)),    # mask
            ws((D, 3 * D)), ws((1, 3 * D)),                   # fused Wqkv, bqkv
            ws((D, D)), ws((1, D)),                           # Wo (un-reshaped), bo
            ws((1, D)), ws((1, D)),                           # ln1 gamma, beta
            ws((D, dff)), ws((1, dff)),                       # W1, b1
            ws((dff, D)), ws((1, D)),                         # W2, b2
            ws((1, D)), ws((1, D)),                           # ln2 gamma, beta
        ]
        return pl.pallas_call(
            kernel,
            out_shape=jax.ShapeDtypeStruct((B, S, D), x.dtype),
            grid=grid,
            in_specs=in_specs,
            out_specs=pl.BlockSpec((bt, S, D), lambda b: (b, 0, 0)),
            scratch_shapes=[pltpu.VMEM((bt * S, D), jnp.float32)],
            compiler_params=pltpu.CompilerParams(
                dimension_semantics=("parallel",),
                vmem_limit_bytes=vmem_limit),
            cost_estimate=cost,
        )

    try:
        return build(True)(*operands)
    except Exception:
        # One-shot retry with default double-buffered weights (some JAX
        # versions reject pipeline_mode=pl.Buffered(1)).  The fallback uses the
        # SAME VMEM budget, so genuine OOM / lowering errors still surface.
        return build(False)(*operands)


def transformer_forward(x, mask, layer_params, n_head, compute_dtype=jnp.bfloat16):
    # PyTorch reference: every block sees the ORIGINAL x and only the last
    # block's output is returned -> running just the last block is identical.
    prepared = prepare_block_params(layer_params[-1], n_head, compute_dtype)
    return transformer_block_pallas(x, mask, prepared, n_head,
                                    compute_dtype=compute_dtype)


# ----------------------------- pure-JAX reference -----------------------------
def transformer_block_ref(x, mask, p, n_head):
    B, S, D = x.shape
    dh = D // n_head
    neg = (mask - 1.0) * 1e9                         # (B,1,S)
    q = x @ p["wq"] + p["bq"]
    k = x @ p["wk"] + p["bk"]
    v = x @ p["wv"] + p["bv"]

    def split(t):                                    # (B,S,D) -> (B,H,S,dh)
        return t.reshape(B, S, n_head, dh).transpose(0, 2, 1, 3)

    qh, kh, vh = split(q), split(k), split(v)
    s = jnp.einsum("bhqd,bhkd->bhqk", qh, kh) / math.sqrt(dh) + neg[:, None, :, :]
    pattn = jax.nn.softmax(s, axis=-1)
    ctx = jnp.einsum("bhqk,bhkd->bhqd", pattn, vh).transpose(0, 2, 1, 3).reshape(B, S, D)
    attn = ctx @ p["wo"] + p["bo"]
    h1 = _layernorm(x + attn, p["ln1_g"], p["ln1_b"])
    f = jnp.maximum(h1 @ p["w1"] + p["b1"], 0.0) @ p["w2"] + p["b2"]
    return _layernorm(h1 + f, p["ln2_g"], p["ln2_b"])


def init_block_params(key, D, dff):
    ks = jax.random.split(key, 6)

    def w(k, shape):
        return jax.random.normal(k, shape, jnp.float32) * 0.02

    return dict(
        wq=w(ks[0], (D, D)), bq=jnp.zeros((1, D), jnp.float32),
        wk=w(ks[1], (D, D)), bk=jnp.zeros((1, D), jnp.float32),
        wv=w(ks[2], (D, D)), bv=jnp.zeros((1, D), jnp.float32),
        wo=w(ks[3], (D, D)), bo=jnp.zeros((1, D), jnp.float32),
        ln1_g=jnp.ones((1, D), jnp.float32), ln1_b=jnp.zeros((1, D), jnp.float32),
        w1=w(ks[4], (D, dff)), b1=jnp.zeros((1, dff), jnp.float32),
        w2=w(ks[5], (dff, D)), b2=jnp.zeros((1, D), jnp.float32),
        ln2_g=jnp.ones((1, D), jnp.float32), ln2_b=jnp.zeros((1, D), jnp.float32),
    )


if __name__ == "__main__":
    # Small shapes consistent with the module's constructor.
    max_len, dim_embed, n_head, dff, n_layers = 8, 32, 4, 64, 2
    batch = 2

    key = jax.random.PRNGKey(0)
    kx, *klayers = jax.random.split(key, 1 + n_layers)

    x = jax.random.normal(kx, (batch, max_len, dim_embed), jnp.float32)
    x_mask = jnp.ones((batch, 1, max_len), jnp.float32)
    x_mask = x_mask.at[1, 0, -2:].set(0.0)   # exercise the masking path

    params = [init_block_params(k, dim_embed, dff) for k in klayers]

    out = transformer_forward(x, x_mask, params, n_head)
    out = jax.block_until_ready(out)
    assert out.shape == (batch, max_len, dim_embed)
    assert bool(jnp.all(jnp.isfinite(out)))

    # Loose numerical check vs f32 pure-JAX reference (kernel matmuls in bf16).
    ref = transformer_block_ref(x, x_mask, params[-1], n_head)
    max_err = float(jnp.max(jnp.abs(out - ref)))
    assert max_err < 0.1, f"max abs error vs reference: {max_err}"

    print("KERNEL_OK")
</pallas_src>

<mosaic_0001>
module attributes {stable_mosaic.version = 11 : i64} {
  func.func @transformer_block_kernel(%arg0: i32, %arg1: memref<1x8x32xf32, #tpu.memory_space<vmem>>, %arg2: memref<1x1x8xf32, #tpu.memory_space<vmem>>, %arg3: memref<32x96xbf16, #tpu.memory_space<vmem>>, %arg4: memref<1x96xf32, #tpu.memory_space<vmem>>, %arg5: memref<32x32xbf16, #tpu.memory_space<vmem>>, %arg6: memref<1x32xf32, #tpu.memory_space<vmem>>, %arg7: memref<1x32xf32, #tpu.memory_space<vmem>>, %arg8: memref<1x32xf32, #tpu.memory_space<vmem>>, %arg9: memref<32x64xbf16, #tpu.memory_space<vmem>>, %arg10: memref<1x64xf32, #tpu.memory_space<vmem>>, %arg11: memref<64x32xbf16, #tpu.memory_space<vmem>>, %arg12: memref<1x32xf32, #tpu.memory_space<vmem>>, %arg13: memref<1x32xf32, #tpu.memory_space<vmem>>, %arg14: memref<1x32xf32, #tpu.memory_space<vmem>>, %arg15: memref<1x8x32xf32, #tpu.memory_space<vmem>>, %arg16: memref<8x32xf32, #tpu.memory_space<vmem>>) attributes {dimension_semantics = [#tpu.dimension_semantics<parallel>], iteration_bounds = array<i64: 2>, scalar_prefetch = 0 : i64, scratch_operands = 1 : i64, tpu.core_type = #tpu.core_type<tc>, window_params = [{transform_indices = @transform_0, window_bounds = array<i64: 1, 8, 32>}, {transform_indices = @transform_1, window_bounds = array<i64: 1, 1, 8>}, {pipeline_mode = #tpu.pipeline_mode<synchronous>, transform_indices = @transform_2, window_bounds = array<i64: 32, 96>}, {pipeline_mode = #tpu.pipeline_mode<synchronous>, transform_indices = @transform_3, window_bounds = array<i64: 1, 96>}, {pipeline_mode = #tpu.pipeline_mode<synchronous>, transform_indices = @transform_4, window_bounds = array<i64: 32, 32>}, {pipeline_mode = #tpu.pipeline_mode<synchronous>, transform_indices = @transform_5, window_bounds = array<i64: 1, 32>}, {pipeline_mode = #tpu.pipeline_mode<synchronous>, transform_indices = @transform_6, window_bounds = array<i64: 1, 32>}, {pipeline_mode = #tpu.pipeline_mode<synchronous>, transform_indices = @transform_7, window_bounds = array<i64: 1, 32>}, {pipeline_mode = #tpu.pipeline_mode<synchronous>, transform_indices = @transform_8, window_bounds = array<i64: 32, 64>}, {pipeline_mode = #tpu.pipeline_mode<synchronous>, transform_indices = @transform_9, window_bounds = array<i64: 1, 64>}, {pipeline_mode = #tpu.pipeline_mode<synchronous>, transform_indices = @transform_10, window_bounds = array<i64: 64, 32>}, {pipeline_mode = #tpu.pipeline_mode<synchronous>, transform_indices = @transform_11, window_bounds = array<i64: 1, 32>}, {pipeline_mode = #tpu.pipeline_mode<synchronous>, transform_indices = @transform_12, window_bounds = array<i64: 1, 32>}, {pipeline_mode = #tpu.pipeline_mode<synchronous>, transform_indices = @transform_13, window_bounds = array<i64: 1, 32>}, {transform_indices = @transform_14, window_bounds = array<i64: 1, 8, 32>}]} {
    %c0 = arith.constant 0 : index
    %c0_0 = arith.constant 0 : index
    %c0_1 = arith.constant 0 : index
    %0 = vector.load %arg1[%c0, %c0_0, %c0_1] : memref<1x8x32xf32, #tpu.memory_space<vmem>>, vector<1x8x32xf32>
    %1 = vector.shape_cast %0 : vector<1x8x32xf32> to vector<8x32xf32>
    %c0_2 = arith.constant 0 : index
    %c0_3 = arith.constant 0 : index
    %c0_4 = arith.constant 0 : index
    %2 = vector.load %arg2[%c0_2, %c0_3, %c0_4] : memref<1x1x8xf32, #tpu.memory_space<vmem>>, vector<1x1x8xf32>
    %cst = arith.constant 1.000000e+00 : f32
    %3 = vector.broadcast %cst : f32 to vector<1x1x8xf32>
    %4 = arith.subf %2, %3 : vector<1x1x8xf32>
    %cst_5 = arith.constant 1.000000e+09 : f32
    %5 = vector.broadcast %cst_5 : f32 to vector<1x1x8xf32>
    %6 = arith.mulf %4, %5 : vector<1x1x8xf32>
    %7 = arith.truncf %1 : vector<8x32xf32> to vector<8x32xbf16>
    %c0_6 = arith.constant 0 : index
    %c0_7 = arith.constant 0 : index
    %8 = vector.load %arg3[%c0_6, %c0_7] : memref<32x96xbf16, #tpu.memory_space<vmem>>, vector<32x96xbf16>
    %cst_8 = arith.constant dense<0.000000e+00> : vector<8x96xf32>
    %9 = tpu.matmul %7, %8, %cst_8 {dimension_numbers = #tpu.dot_dimension_numbers<[1], [0], [0], [1], [0, 0, 1, 1], [], []>} : vector<8x32xbf16>, vector<32x96xbf16>, vector<8x96xf32> -> vector<8x96xf32>
    %c0_9 = arith.constant 0 : index
    %c0_10 = arith.constant 0 : index
    %10 = vector.load %arg4[%c0_9, %c0_10] : memref<1x96xf32, #tpu.memory_space<vmem>>, vector<1x96xf32>
    %11 = vector.broadcast %10 : vector<1x96xf32> to vector<8x96xf32>
    %12 = arith.addf %9, %11 : vector<8x96xf32>
    %13 = arith.truncf %12 : vector<8x96xf32> to vector<8x96xbf16>
    %14 = vector.extract_strided_slice %13 {offsets = [0, 0], sizes = [8, 32], strides = [1, 1]} : vector<8x96xbf16> to vector<8x32xbf16>
    %15 = vector.extract_strided_slice %13 {offsets = [0, 32], sizes = [8, 32], strides = [1, 1]} : vector<8x96xbf16> to vector<8x32xbf16>
    %16 = vector.extract_strided_slice %13 {offsets = [0, 64], sizes = [8, 32], strides = [1, 1]} : vector<8x96xbf16> to vector<8x32xbf16>
    %17 = vector.shape_cast %6 : vector<1x1x8xf32> to vector<1x8xf32>
    %18 = vector.extract_strided_slice %14 {offsets = [0, 0], sizes = [8, 8], strides = [1, 1]} : vector<8x32xbf16> to vector<8x8xbf16>
    %19 = vector.extract_strided_slice %15 {offsets = [0, 0], sizes = [8, 8], strides = [1, 1]} : vector<8x32xbf16> to vector<8x8xbf16>
    %20 = vector.extract_strided_slice %16 {offsets = [0, 0], sizes = [8, 8], strides = [1, 1]} : vector<8x32xbf16> to vector<8x8xbf16>
    %21 = tpu.transpose %19, [1, 0] : vector<8x8xbf16> -> vector<8x8xbf16>
    %cst_11 = arith.constant dense<0.000000e+00> : vector<8x8xf32>
    %22 = tpu.matmul %18, %21, %cst_11 {dimension_numbers = #tpu.dot_dimension_numbers<[1], [0], [0], [1], [0, 0, 1, 1], [], []>} : vector<8x8xbf16>, vector<8x8xbf16>, vector<8x8xf32> -> vector<8x8xf32>
    %23 = vector.broadcast %17 : vector<1x8xf32> to vector<8x8xf32>
    %24 = arith.addf %22, %23 : vector<8x8xf32>
    %cst_12 = arith.constant dense<0xFF800000> : vector<8xf32>
    %25 = vector.multi_reduction <maximumf>, %24, %cst_12 [1] : vector<8x8xf32> to vector<8xf32>
    %26 = vector.shape_cast %25 : vector<8xf32> to vector<8x1xf32>
    %27 = vector.broadcast %26 : vector<8x1xf32> to vector<8x8xf32>
    %28 = arith.subf %24, %27 : vector<8x8xf32>
    %29 = math.exp %28 : vector<8x8xf32>
    %cst_13 = arith.constant dense<0.000000e+00> : vector<8xf32>
    %30 = vector.multi_reduction <add>, %29, %cst_13 [1] : vector<8x8xf32> to vector<8xf32>
    %31 = vector.shape_cast %30 : vector<8xf32> to vector<8x1xf32>
    %32 = tpu.reciprocal %31 {approx = true} : vector<8x1xf32> -> vector<8x1xf32>
    %33 = vector.broadcast %32 : vector<8x1xf32> to vector<8x8xf32>
    %34 = arith.mulf %29, %33 : vector<8x8xf32>
    %35 = arith.truncf %34 : vector<8x8xf32> to vector<8x8xbf16>
    %cst_14 = arith.constant dense<0.000000e+00> : vector<8x8xf32>
    %36 = tpu.matmul %35, %20, %cst_14 {dimension_numbers = #tpu.dot_dimension_numbers<[1], [0], [0], [1], [0, 0, 1, 1], [], []>} : vector<8x8xbf16>, vector<8x8xbf16>, vector<8x8xf32> -> vector<8x8xf32>
    %37 = vector.extract_strided_slice %14 {offsets = [0, 8], sizes = [8, 8], strides = [1, 1]} : vector<8x32xbf16> to vector<8x8xbf16>
    %38 = vector.extract_strided_slice %15 {offsets = [0, 8], sizes = [8, 8], strides = [1, 1]} : vector<8x32xbf16> to vector<8x8xbf16>
    %39 = vector.extract_strided_slice %16 {offsets = [0, 8], sizes = [8, 8], strides = [1, 1]} : vector<8x32xbf16> to vector<8x8xbf16>
    %40 = tpu.transpose %38, [1, 0] : vector<8x8xbf16> -> vector<8x8xbf16>
    %cst_15 = arith.constant dense<0.000000e+00> : vector<8x8xf32>
    %41 = tpu.matmul %37, %40, %cst_15 {dimension_numbers = #tpu.dot_dimension_numbers<[1], [0], [0], [1], [0, 0, 1, 1], [], []>} : vector<8x8xbf16>, vector<8x8xbf16>, vector<8x8xf32> -> vector<8x8xf32>
    %42 = vector.broadcast %17 : vector<1x8xf32> to vector<8x8xf32>
    %43 = arith.addf %41, %42 : vector<8x8xf32>
    %cst_16 = arith.constant dense<0xFF800000> : vector<8xf32>
    %44 = vector.multi_reduction <maximumf>, %43, %cst_16 [1] : vector<8x8xf32> to vector<8xf32>
    %45 = vector.shape_cast %44 : vector<8xf32> to vector<8x1xf32>
    %46 = vector.broadcast %45 : vector<8x1xf32> to vector<8x8xf32>
    %47 = arith.subf %43, %46 : vector<8x8xf32>
    %48 = math.exp %47 : vector<8x8xf32>
    %cst_17 = arith.constant dense<0.000000e+00> : vector<8xf32>
    %49 = vector.multi_reduction <add>, %48, %cst_17 [1] : vector<8x8xf32> to vector<8xf32>
    %50 = vector.shape_cast %49 : vector<8xf32> to vector<8x1xf32>
    %51 = tpu.reciprocal %50 {approx = true} : vector<8x1xf32> -> vector<8x1xf32>
    %52 = vector.broadcast %51 : vector<8x1xf32> to vector<8x8xf32>
    %53 = arith.mulf %48, %52 : vector<8x8xf32>
    %54 = arith.truncf %53 : vector<8x8xf32> to vector<8x8xbf16>
    %cst_18 = arith.constant dense<0.000000e+00> : vector<8x8xf32>
    %55 = tpu.matmul %54, %39, %cst_18 {dimension_numbers = #tpu.dot_dimension_numbers<[1], [0], [0], [1], [0, 0, 1, 1], [], []>} : vector<8x8xbf16>, vector<8x8xbf16>, vector<8x8xf32> -> vector<8x8xf32>
    %56 = vector.extract_strided_slice %14 {offsets = [0, 16], sizes = [8, 8], strides = [1, 1]} : vector<8x32xbf16> to vector<8x8xbf16>
    %57 = vector.extract_strided_slice %15 {offsets = [0, 16], sizes = [8, 8], strides = [1, 1]} : vector<8x32xbf16> to vector<8x8xbf16>
    %58 = vector.extract_strided_slice %16 {offsets = [0, 16], sizes = [8, 8], strides = [1, 1]} : vector<8x32xbf16> to vector<8x8xbf16>
    %59 = tpu.transpose %57, [1, 0] : vector<8x8xbf16> -> vector<8x8xbf16>
    %cst_19 = arith.constant dense<0.000000e+00> : vector<8x8xf32>
    %60 = tpu.matmul %56, %59, %cst_19 {dimension_numbers = #tpu.dot_dimension_numbers<[1], [0], [0], [1], [0, 0, 1, 1], [], []>} : vector<8x8xbf16>, vector<8x8xbf16>, vector<8x8xf32> -> vector<8x8xf32>
    %61 = vector.broadcast %17 : vector<1x8xf32> to vector<8x8xf32>
    %62 = arith.addf %60, %61 : vector<8x8xf32>
    %cst_20 = arith.constant dense<0xFF800000> : vector<8xf32>
    %63 = vector.multi_reduction <maximumf>, %62, %cst_20 [1] : vector<8x8xf32> to vector<8xf32>
    %64 = vector.shape_cast %63 : vector<8xf32> to vector<8x1xf32>
    %65 = vector.broadcast %64 : vector<8x1xf32> to vector<8x8xf32>
    %66 = arith.subf %62, %65 : vector<8x8xf32>
    %67 = math.exp %66 : vector<8x8xf32>
    %cst_21 = arith.constant dense<0.000000e+00> : vector<8xf32>
    %68 = vector.multi_reduction <add>, %67, %cst_21 [1] : vector<8x8xf32> to vector<8xf32>
    %69 = vector.shape_cast %68 : vector<8xf32> to vector<8x1xf32>
    %70 = tpu.reciprocal %69 {approx = true} : vector<8x1xf32> -> vector<8x1xf32>
    %71 = vector.broadcast %70 : vector<8x1xf32> to vector<8x8xf32>
    %72 = arith.mulf %67, %71 : vector<8x8xf32>
    %73 = arith.truncf %72 : vector<8x8xf32> to vector<8x8xbf16>
    %cst_22 = arith.constant dense<0.000000e+00> : vector<8x8xf32>
    %74 = tpu.matmul %73, %58, %cst_22 {dimension_numbers = #tpu.dot_dimension_numbers<[1], [0], [0], [1], [0, 0, 1, 1], [], []>} : vector<8x8xbf16>, vector<8x8xbf16>, vector<8x8xf32> -> vector<8x8xf32>
    %75 = vector.extract_strided_slice %14 {offsets = [0, 24], sizes = [8, 8], strides = [1, 1]} : vector<8x32xbf16> to vector<8x8xbf16>
    %76 = vector.extract_strided_slice %15 {offsets = [0, 24], sizes = [8, 8], strides = [1, 1]} : vector<8x32xbf16> to vector<8x8xbf16>
    %77 = vector.extract_strided_slice %16 {offsets = [0, 24], sizes = [8, 8], strides = [1, 1]} : vector<8x32xbf16> to vector<8x8xbf16>
    %78 = tpu.transpose %76, [1, 0] : vector<8x8xbf16> -> vector<8x8xbf16>
    %cst_23 = arith.constant dense<0.000000e+00> : vector<8x8xf32>
    %79 = tpu.matmul %75, %78, %cst_23 {dimension_numbers = #tpu.dot_dimension_numbers<[1], [0], [0], [1], [0, 0, 1, 1], [], []>} : vector<8x8xbf16>, vector<8x8xbf16>, vector<8x8xf32> -> vector<8x8xf32>
    %80 = vector.broadcast %17 : vector<1x8xf32> to vector<8x8xf32>
    %81 = arith.addf %79, %80 : vector<8x8xf32>
    %cst_24 = arith.constant dense<0xFF800000> : vector<8xf32>
    %82 = vector.multi_reduction <maximumf>, %81, %cst_24 [1] : vector<8x8xf32> to vector<8xf32>
    %83 = vector.shape_cast %82 : vector<8xf32> to vector<8x1xf32>
    %84 = vector.broadcast %83 : vector<8x1xf32> to vector<8x8xf32>
    %85 = arith.subf %81, %84 : vector<8x8xf32>
    %86 = math.exp %85 : vector<8x8xf32>
    %cst_25 = arith.constant dense<0.000000e+00> : vector<8xf32>
    %87 = vector.multi_reduction <add>, %86, %cst_25 [1] : vector<8x8xf32> to vector<8xf32>
    %88 = vector.shape_cast %87 : vector<8xf32> to vector<8x1xf32>
    %89 = tpu.reciprocal %88 {approx = true} : vector<8x1xf32> -> vector<8x1xf32>
    %90 = vector.broadcast %89 : vector<8x1xf32> to vector<8x8xf32>
    %91 = arith.mulf %86, %90 : vector<8x8xf32>
    %92 = arith.truncf %91 : vector<8x8xf32> to vector<8x8xbf16>
    %cst_26 = arith.constant dense<0.000000e+00> : vector<8x8xf32>
    %93 = tpu.matmul %92, %77, %cst_26 {dimension_numbers = #tpu.dot_dimension_numbers<[1], [0], [0], [1], [0, 0, 1, 1], [], []>} : vector<8x8xbf16>, vector<8x8xbf16>, vector<8x8xf32> -> vector<8x8xf32>
    %94 = tpu.concatenate %36, %55, %74, %93 in 1 : vector<8x8xf32>, vector<8x8xf32>, vector<8x8xf32>, vector<8x8xf32> -> vector<8x32xf32>
    %c0_27 = arith.constant 0 : index
    %c0_28 = arith.constant 0 : index
    %95 = vector.load %arg16[%c0_27, %c0_28] : memref<8x32xf32, #tpu.memory_space<vmem>>, vector<8x32xf32>
    tpu.vector_store %arg16[%c0_27, %c0_28], %94 {strides = array<i32>} : memref<8x32xf32, #tpu.memory_space<vmem>>, vector<8x32xf32>,
    %c0_29 = arith.constant 0 : index
    %c0_30 = arith.constant 0 : index
    %96 = vector.load %arg16[%c0_29, %c0_30] : memref<8x32xf32, #tpu.memory_space<vmem>>, vector<8x32xf32>
    %97 = arith.truncf %96 : vector<8x32xf32> to vector<8x32xbf16>
    %c0_31 = arith.constant 0 : index
    %c0_32 = arith.constant 0 : index
    %98 = vector.load %arg5[%c0_31, %c0_32] : memref<32x32xbf16, #tpu.memory_space<vmem>>, vector<32x32xbf16>
    %cst_33 = arith.constant dense<0.000000e+00> : vector<8x32xf32>
    %99 = tpu.matmul %97, %98, %cst_33 {dimension_numbers = #tpu.dot_dimension_numbers<[1], [0], [0], [1], [0, 0, 1, 1], [], []>} : vector<8x32xbf16>, vector<32x32xbf16>, vector<8x32xf32> -> vector<8x32xf32>
    %c0_34 = arith.constant 0 : index
    %c0_35 = arith.constant 0 : index
    %100 = vector.load %arg6[%c0_34, %c0_35] : memref<1x32xf32, #tpu.memory_space<vmem>>, vector<1x32xf32>
    %101 = vector.broadcast %100 : vector<1x32xf32> to vector<8x32xf32>
    %102 = arith.addf %99, %101 : vector<8x32xf32>
    %103 = arith.addf %1, %102 : vector<8x32xf32>
    %c0_36 = arith.constant 0 : index
    %c0_37 = arith.constant 0 : index
    %104 = vector.load %arg7[%c0_36, %c0_37] : memref<1x32xf32, #tpu.memory_space<vmem>>, vector<1x32xf32>
    %c0_38 = arith.constant 0 : index
    %c0_39 = arith.constant 0 : index
    %105 = vector.load %arg8[%c0_38, %c0_39] : memref<1x32xf32, #tpu.memory_space<vmem>>, vector<1x32xf32>
    %cst_40 = arith.constant dense<0.000000e+00> : vector<8xf32>
    %106 = vector.multi_reduction <add>, %103, %cst_40 [1] : vector<8x32xf32> to vector<8xf32>
    %107 = vector.shape_cast %106 : vector<8xf32> to vector<8x1xf32>
    %cst_41 = arith.constant 3.200000e+01 : f32
    %108 = vector.broadcast %cst_41 : f32 to vector<8x1xf32>
    %109 = arith.divf %107, %108 : vector<8x1xf32>
    %110 = vector.broadcast %109 : vector<8x1xf32> to vector<8x32xf32>
    %111 = arith.subf %103, %110 : vector<8x32xf32>
    %112 = arith.mulf %111, %111 : vector<8x32xf32>
    %cst_42 = arith.constant dense<0.000000e+00> : vector<8xf32>
    %113 = vector.multi_reduction <add>, %112, %cst_42 [1] : vector<8x32xf32> to vector<8xf32>
    %114 = vector.shape_cast %113 : vector<8xf32> to vector<8x1xf32>
    %cst_43 = arith.constant 3.200000e+01 : f32
    %115 = vector.broadcast %cst_43 : f32 to vector<8x1xf32>
    %116 = arith.divf %114, %115 : vector<8x1xf32>
    %117 = vector.broadcast %109 : vector<8x1xf32> to vector<8x32xf32>
    %118 = arith.subf %103, %117 : vector<8x32xf32>
    %cst_44 = arith.constant 9.99999974E-6 : f32
    %119 = vector.broadcast %cst_44 : f32 to vector<8x1xf32>
    %120 = arith.addf %116, %119 : vector<8x1xf32>
    %121 = math.rsqrt %120 : vector<8x1xf32>
    %122 = vector.broadcast %121 : vector<8x1xf32> to vector<8x32xf32>
    %123 = arith.mulf %118, %122 : vector<8x32xf32>
    %124 = vector.broadcast %104 : vector<1x32xf32> to vector<8x32xf32>
    %125 = arith.mulf %123, %124 : vector<8x32xf32>
    %126 = vector.broadcast %105 : vector<1x32xf32> to vector<8x32xf32>
    %127 = arith.addf %125, %126 : vector<8x32xf32>
    %128 = arith.truncf %127 : vector<8x32xf32> to vector<8x32xbf16>
    %c0_45 = arith.constant 0 : index
    %c0_46 = arith.constant 0 : index
    %129 = vector.load %arg9[%c0_45, %c0_46] : memref<32x64xbf16, #tpu.memory_space<vmem>>, vector<32x64xbf16>
    %cst_47 = arith.constant dense<0.000000e+00> : vector<8x64xf32>
    %130 = tpu.matmul %128, %129, %cst_47 {dimension_numbers = #tpu.dot_dimension_numbers<[1], [0], [0], [1], [0, 0, 1, 1], [], []>} : vector<8x32xbf16>, vector<32x64xbf16>, vector<8x64xf32> -> vector<8x64xf32>
    %c0_48 = arith.constant 0 : index
    %c0_49 = arith.constant 0 : index
    %131 = vector.load %arg10[%c0_48, %c0_49] : memref<1x64xf32, #tpu.memory_space<vmem>>, vector<1x64xf32>
    %132 = vector.broadcast %131 : vector<1x64xf32> to vector<8x64xf32>
    %133 = arith.addf %130, %132 : vector<8x64xf32>
    %cst_50 = arith.constant 0.000000e+00 : f32
    %134 = vector.broadcast %cst_50 : f32 to vector<8x64xf32>
    %135 = arith.maximumf %133, %134 : vector<8x64xf32>
    %136 = arith.truncf %135 : vector<8x64xf32> to vector<8x64xbf16>
    %c0_51 = arith.constant 0 : index
    %c0_52 = arith.constant 0 : index
    %137 = vector.load %arg11[%c0_51, %c0_52] : memref<64x32xbf16, #tpu.memory_space<vmem>>, vector<64x32xbf16>
    %cst_53 = arith.constant dense<0.000000e+00> : vector<8x32xf32>
    %138 = tpu.matmul %136, %137, %cst_53 {dimension_numbers = #tpu.dot_dimension_numbers<[1], [0], [0], [1], [0, 0, 1, 1], [], []>} : vector<8x64xbf16>, vector<64x32xbf16>, vector<8x32xf32> -> vector<8x32xf32>
    %c0_54 = arith.constant 0 : index
    %c0_55 = arith.constant 0 : index
    %139 = vector.load %arg12[%c0_54, %c0_55] : memref<1x32xf32, #tpu.memory_space<vmem>>, vector<1x32xf32>
    %140 = vector.broadcast %139 : vector<1x32xf32> to vector<8x32xf32>
    %141 = arith.addf %138, %140 : vector<8x32xf32>
    %142 = arith.addf %127, %141 : vector<8x32xf32>
    %c0_56 = arith.constant 0 : index
    %c0_57 = arith.constant 0 : index
    %143 = vector.load %arg13[%c0_56, %c0_57] : memref<1x32xf32, #tpu.memory_space<vmem>>, vector<1x32xf32>
    %c0_58 = arith.constant 0 : index
    %c0_59 = arith.constant 0 : index
    %144 = vector.load %arg14[%c0_58, %c0_59] : memref<1x32xf32, #tpu.memory_space<vmem>>, vector<1x32xf32>
    %cst_60 = arith.constant dense<0.000000e+00> : vector<8xf32>
    %145 = vector.multi_reduction <add>, %142, %cst_60 [1] : vector<8x32xf32> to vector<8xf32>
    %146 = vector.shape_cast %145 : vector<8xf32> to vector<8x1xf32>
    %cst_61 = arith.constant 3.200000e+01 : f32
    %147 = vector.broadcast %cst_61 : f32 to vector<8x1xf32>
    %148 = arith.divf %146, %147 : vector<8x1xf32>
    %149 = vector.broadcast %148 : vector<8x1xf32> to vector<8x32xf32>
    %150 = arith.subf %142, %149 : vector<8x32xf32>
    %151 = arith.mulf %150, %150 : vector<8x32xf32>
    %cst_62 = arith.constant dense<0.000000e+00> : vector<8xf32>
    %152 = vector.multi_reduction <add>, %151, %cst_62 [1] : vector<8x32xf32> to vector<8xf32>
    %153 = vector.shape_cast %152 : vector<8xf32> to vector<8x1xf32>
    %cst_63 = arith.constant 3.200000e+01 : f32
    %154 = vector.broadcast %cst_63 : f32 to vector<8x1xf32>
    %155 = arith.divf %153, %154 : vector<8x1xf32>
    %156 = vector.broadcast %148 : vector<8x1xf32> to vector<8x32xf32>
    %157 = arith.subf %142, %156 : vector<8x32xf32>
    %cst_64 = arith.constant 9.99999974E-6 : f32
    %158 = vector.broadcast %cst_64 : f32 to vector<8x1xf32>
    %159 = arith.addf %155, %158 : vector<8x1xf32>
    %160 = math.rsqrt %159 : vector<8x1xf32>
    %161 = vector.broadcast %160 : vector<8x1xf32> to vector<8x32xf32>
    %162 = arith.mulf %157, %161 : vector<8x32xf32>
    %163 = vector.broadcast %143 : vector<1x32xf32> to vector<8x32xf32>
    %164 = arith.mulf %162, %163 : vector<8x32xf32>
    %165 = vector.broadcast %144 : vector<1x32xf32> to vector<8x32xf32>
    %166 = arith.addf %164, %165 : vector<8x32xf32>
    %167 = vector.shape_cast %166 : vector<8x32xf32> to vector<1x8x32xf32>
    %c0_65 = arith.constant 0 : index
    %c0_66 = arith.constant 0 : index
    %c0_67 = arith.constant 0 : index
    %168 = vector.load %arg15[%c0_65, %c0_66, %c0_67] : memref<1x8x32xf32, #tpu.memory_space<vmem>>, vector<1x8x32xf32>
    tpu.vector_store %arg15[%c0_65, %c0_66, %c0_67], %167 {strides = array<i32>} : memref<1x8x32xf32, #tpu.memory_space<vmem>>, vector<1x8x32xf32>,
    return
  }
  func.func @transform_0(%arg0: i32) -> (i32, i32, i32) {
    %c0_i32 = arith.constant 0 : i32
    %c0_i32_0 = arith.constant 0 : i32
    %c0_i32_1 = arith.constant 0 : i32
    return %arg0, %c0_i32, %c0_i32_0 : i32, i32, i32
  }
  func.func @transform_1(%arg0: i32) -> (i32, i32, i32) {
    %c0_i32 = arith.constant 0 : i32
    %c0_i32_0 = arith.constant 0 : i32
    %c0_i32_1 = arith.constant 0 : i32
    return %arg0, %c0_i32, %c0_i32_0 : i32, i32, i32
  }
  func.func @transform_2(%arg0: i32) -> (i32, i32) {
    %c0_i32 = arith.constant 0 : i32
    %c0_i32_0 = arith.constant 0 : i32
    %c0_i32_1 = arith.constant 0 : i32
    return %c0_i32, %c0_i32_0 : i32, i32
  }
  func.func @transform_3(%arg0: i32) -> (i32, i32) {
    %c0_i32 = arith.constant 0 : i32
    %c0_i32_0 = arith.constant 0 : i32
    %c0_i32_1 = arith.constant 0 : i32
    return %c0_i32, %c0_i32_0 : i32, i32
  }
  func.func @transform_4(%arg0: i32) -> (i32, i32) {
    %c0_i32 = arith.constant 0 : i32
    %c0_i32_0 = arith.constant 0 : i32
    %c0_i32_1 = arith.constant 0 : i32
    return %c0_i32, %c0_i32_0 : i32, i32
  }
  func.func @transform_5(%arg0: i32) -> (i32, i32) {
    %c0_i32 = arith.constant 0 : i32
    %c0_i32_0 = arith.constant 0 : i32
    %c0_i32_1 = arith.constant 0 : i32
    return %c0_i32, %c0_i32_0 : i32, i32
  }
  func.func @transform_6(%arg0: i32) -> (i32, i32) {
    %c0_i32 = arith.constant 0 : i32
    %c0_i32_0 = arith.constant 0 : i32
    %c0_i32_1 = arith.constant 0 : i32
    return %c0_i32, %c0_i32_0 : i32, i32
  }
  func.func @transform_7(%arg0: i32) -> (i32, i32) {
    %c0_i32 = arith.constant 0 : i32
    %c0_i32_0 = arith.constant 0 : i32
    %c0_i32_1 = arith.constant 0 : i32
    return %c0_i32, %c0_i32_0 : i32, i32
  }
  func.func @transform_8(%arg0: i32) -> (i32, i32) {
    %c0_i32 = arith.constant 0 : i32
    %c0_i32_0 = arith.constant 0 : i32
    %c0_i32_1 = arith.constant 0 : i32
    return %c0_i32, %c0_i32_0 : i32, i32
  }
  func.func @transform_9(%arg0: i32) -> (i32, i32) {
    %c0_i32 = arith.constant 0 : i32
    %c0_i32_0 = arith.constant 0 : i32
    %c0_i32_1 = arith.constant 0 : i32
    return %c0_i32, %c0_i32_0 : i32, i32
  }
  func.func @transform_10(%arg0: i32) -> (i32, i32) {
    %c0_i32 = arith.constant 0 : i32
    %c0_i32_0 = arith.constant 0 : i32
    %c0_i32_1 = arith.constant 0 : i32
    return %c0_i32, %c0_i32_0 : i32, i32
  }
  func.func @transform_11(%arg0: i32) -> (i32, i32) {
    %c0_i32 = arith.constant 0 : i32
    %c0_i32_0 = arith.constant 0 : i32
    %c0_i32_1 = arith.constant 0 : i32
    return %c0_i32, %c0_i32_0 : i32, i32
  }
  func.func @transform_12(%arg0: i32) -> (i32, i32) {
    %c0_i32 = arith.constant 0 : i32
    %c0_i32_0 = arith.constant 0 : i32
    %c0_i32_1 = arith.constant 0 : i32
    return %c0_i32, %c0_i32_0 : i32, i32
  }
  func.func @transform_13(%arg0: i32) -> (i32, i32) {
    %c0_i32 = arith.constant 0 : i32
    %c0_i32_0 = arith.constant 0 : i32
    %c0_i32_1 = arith.constant 0 : i32
    return %c0_i32, %c0_i32_0 : i32, i32
  }
  func.func @transform_14(%arg0: i32) -> (i32, i32, i32) {
    %c0_i32 = arith.constant 0 : i32
    %c0_i32_0 = arith.constant 0 : i32
    %c0_i32_1 = arith.constant 0 : i32
    return %arg0, %c0_i32, %c0_i32_0 : i32, i32, i32
  }
}

module attributes {stable_mosaic.version = 11 : i64} {
  func.func @transformer_block_kernel(%arg0: i32, %arg1: memref<1x8x32xf32, #tpu.memory_space<vmem>>, %arg2: memref<1x1x8xf32, #tpu.memory_space<vmem>>, %arg3: memref<32x96xbf16, #tpu.memory_space<vmem>>, %arg4: memref<1x96xf32, #tpu.memory_space<vmem>>, %arg5: memref<32x32xbf16, #tpu.memory_space<vmem>>, %arg6: memref<1x32xf32, #tpu.memory_space<vmem>>, %arg7: memref<1x32xf32, #tpu.memory_space<vmem>>, %arg8: memref<1x32xf32, #tpu.memory_space<vmem>>, %arg9: memref<32x64xbf16, #tpu.memory_space<vmem>>, %arg10: memref<1x64xf32, #tpu.memory_space<vmem>>, %arg11: memref<64x32xbf16, #tpu.memory_space<vmem>>, %arg12: memref<1x32xf32, #tpu.memory_space<vmem>>, %arg13: memref<1x32xf32, #tpu.memory_space<vmem>>, %arg14: memref<1x32xf32, #tpu.memory_space<vmem>>, %arg15: memref<1x8x32xf32, #tpu.memory_space<vmem>>, %arg16: memref<8x32xf32, #tpu.memory_space<vmem>>) attributes {dimension_semantics = [#tpu.dimension_semantics<parallel>], iteration_bounds = array<i64: 2>, scalar_prefetch = 0 : i64, scratch_operands = 1 : i64, tpu.core_type = #tpu.core_type<tc>, window_params = [{transform_indices = @transform_0, window_bounds = array<i64: 1, 8, 32>}, {transform_indices = @transform_1, window_bounds = array<i64: 1, 1, 8>}, {pipeline_mode = #tpu.pipeline_mode<synchronous>, transform_indices = @transform_2, window_bounds = array<i64: 32, 96>}, {pipeline_mode = #tpu.pipeline_mode<synchronous>, transform_indices = @transform_3, window_bounds = array<i64: 1, 96>}, {pipeline_mode = #tpu.pipeline_mode<synchronous>, transform_indices = @transform_4, window_bounds = array<i64: 32, 32>}, {pipeline_mode = #tpu.pipeline_mode<synchronous>, transform_indices = @transform_5, window_bounds = array<i64: 1, 32>}, {pipeline_mode = #tpu.pipeline_mode<synchronous>, transform_indices = @transform_6, window_bounds = array<i64: 1, 32>}, {pipeline_mode = #tpu.pipeline_mode<synchronous>, transform_indices = @transform_7, window_bounds = array<i64: 1, 32>}, {pipeline_mode = #tpu.pipeline_mode<synchronous>, transform_indices = @transform_8, window_bounds = array<i64: 32, 64>}, {pipeline_mode = #tpu.pipeline_mode<synchronous>, transform_indices = @transform_9, window_bounds = array<i64: 1, 64>}, {pipeline_mode = #tpu.pipeline_mode<synchronous>, transform_indices = @transform_10, window_bounds = array<i64: 64, 32>}, {pipeline_mode = #tpu.pipeline_mode<synchronous>, transform_indices = @transform_11, window_bounds = array<i64: 1, 32>}, {pipeline_mode = #tpu.pipeline_mode<synchronous>, transform_indices = @transform_12, window_bounds = array<i64: 1, 32>}, {pipeline_mode = #tpu.pipeline_mode<synchronous>, transform_indices = @transform_13, window_bounds = array<i64: 1, 32>}, {transform_indices = @transform_14, window_bounds = array<i64: 1, 8, 32>}]} {
    %c0 = arith.constant 0 : index
    %c0_0 = arith.constant 0 : index
    %c0_1 = arith.constant 0 : index
    %0 = vector.load %arg1[%c0, %c0_0, %c0_1] : memref<1x8x32xf32, #tpu.memory_space<vmem>>, vector<1x8x32xf32>
    %1 = vector.shape_cast %0 : vector<1x8x32xf32> to vector<8x32xf32>
    %c0_2 = arith.constant 0 : index
    %c0_3 = arith.constant 0 : index
    %c0_4 = arith.constant 0 : index
    %2 = vector.load %arg2[%c0_2, %c0_3, %c0_4] : memref<1x1x8xf32, #tpu.memory_space<vmem>>, vector<1x1x8xf32>
    %cst = arith.constant 1.000000e+00 : f32
    %3 = vector.broadcast %cst : f32 to vector<1x1x8xf32>
    %4 = arith.subf %2, %3 : vector<1x1x8xf32>
    %cst_5 = arith.constant 1.000000e+09 : f32
    %5 = vector.broadcast %cst_5 : f32 to vector<1x1x8xf32>
    %6 = arith.mulf %4, %5 : vector<1x1x8xf32>
    %7 = arith.truncf %1 : vector<8x32xf32> to vector<8x32xbf16>
    %c0_6 = arith.constant 0 : index
    %c0_7 = arith.constant 0 : index
    %8 = vector.load %arg3[%c0_6, %c0_7] : memref<32x96xbf16, #tpu.memory_space<vmem>>, vector<32x96xbf16>
    %cst_8 = arith.constant dense<0.000000e+00> : vector<8x96xf32>
    %9 = tpu.matmul %7, %8, %cst_8 {dimension_numbers = #tpu.dot_dimension_numbers<[1], [0], [0], [1], [0, 0, 1, 1], [], []>} : vector<8x32xbf16>, vector<32x96xbf16>, vector<8x96xf32> -> vector<8x96xf32>
    %c0_9 = arith.constant 0 : index
    %c0_10 = arith.constant 0 : index
    %10 = vector.load %arg4[%c0_9, %c0_10] : memref<1x96xf32, #tpu.memory_space<vmem>>, vector<1x96xf32>
    %11 = vector.broadcast %10 : vector<1x96xf32> to vector<8x96xf32>
    %12 = arith.addf %9, %11 : vector<8x96xf32>
    %13 = arith.truncf %12 : vector<8x96xf32> to vector<8x96xbf16>
    %14 = vector.extract_strided_slice %13 {offsets = [0, 0], sizes = [8, 32], strides = [1, 1]} : vector<8x96xbf16> to vector<8x32xbf16>
    %15 = vector.extract_strided_slice %13 {offsets = [0, 32], sizes = [8, 32], strides = [1, 1]} : vector<8x96xbf16> to vector<8x32xbf16>
    %16 = vector.extract_strided_slice %13 {offsets = [0, 64], sizes = [8, 32], strides = [1, 1]} : vector<8x96xbf16> to vector<8x32xbf16>
    %17 = vector.shape_cast %6 : vector<1x1x8xf32> to vector<1x8xf32>
    %18 = vector.extract_strided_slice %14 {offsets = [0, 0], sizes = [8, 8], strides = [1, 1]} : vector<8x32xbf16> to vector<8x8xbf16>
    %19 = vector.extract_strided_slice %15 {offsets = [0, 0], sizes = [8, 8], strides = [1, 1]} : vector<8x32xbf16> to vector<8x8xbf16>
    %20 = vector.extract_strided_slice %16 {offsets = [0, 0], sizes = [8, 8], strides = [1, 1]} : vector<8x32xbf16> to vector<8x8xbf16>
    %21 = tpu.transpose %19, [1, 0] : vector<8x8xbf16> -> vector<8x8xbf16>
    %cst_11 = arith.constant dense<0.000000e+00> : vector<8x8xf32>
    %22 = tpu.matmul %18, %21, %cst_11 {dimension_numbers = #tpu.dot_dimension_numbers<[1], [0], [0], [1], [0, 0, 1, 1], [], []>} : vector<8x8xbf16>, vector<8x8xbf16>, vector<8x8xf32> -> vector<8x8xf32>
    %23 = vector.broadcast %17 : vector<1x8xf32> to vector<8x8xf32>
    %24 = arith.addf %22, %23 : vector<8x8xf32>
    %cst_12 = arith.constant dense<0xFF800000> : vector<8xf32>
    %25 = vector.multi_reduction <maximumf>, %24, %cst_12 [1] : vector<8x8xf32> to vector<8xf32>
    %26 = vector.shape_cast %25 : vector<8xf32> to vector<8x1xf32>
    %27 = vector.broadcast %26 : vector<8x1xf32> to vector<8x8xf32>
    %28 = arith.subf %24, %27 : vector<8x8xf32>
    %29 = math.exp %28 : vector<8x8xf32>
    %cst_13 = arith.constant dense<0.000000e+00> : vector<8xf32>
    %30 = vector.multi_reduction <add>, %29, %cst_13 [1] : vector<8x8xf32> to vector<8xf32>
    %31 = vector.shape_cast %30 : vector<8xf32> to vector<8x1xf32>
    %32 = tpu.reciprocal %31 {approx = true} : vector<8x1xf32> -> vector<8x1xf32>
    %33 = vector.broadcast %32 : vector<8x1xf32> to vector<8x8xf32>
    %34 = arith.mulf %29, %33 : vector<8x8xf32>
    %35 = arith.truncf %34 : vector<8x8xf32> to vector<8x8xbf16>
    %cst_14 = arith.constant dense<0.000000e+00> : vector<8x8xf32>
    %36 = tpu.matmul %35, %20, %cst_14 {dimension_numbers = #tpu.dot_dimension_numbers<[1], [0], [0], [1], [0, 0, 1, 1], [], []>} : vector<8x8xbf16>, vector<8x8xbf16>, vector<8x8xf32> -> vector<8x8xf32>
    %37 = vector.extract_strided_slice %14 {offsets = [0, 8], sizes = [8, 8], strides = [1, 1]} : vector<8x32xbf16> to vector<8x8xbf16>
    %38 = vector.extract_strided_slice %15 {offsets = [0, 8], sizes = [8, 8], strides = [1, 1]} : vector<8x32xbf16> to vector<8x8xbf16>
    %39 = vector.extract_strided_slice %16 {offsets = [0, 8], sizes = [8, 8], strides = [1, 1]} : vector<8x32xbf16> to vector<8x8xbf16>
    %40 = tpu.transpose %38, [1, 0] : vector<8x8xbf16> -> vector<8x8xbf16>
    %cst_15 = arith.constant dense<0.000000e+00> : vector<8x8xf32>
    %41 = tpu.matmul %37, %40, %cst_15 {dimension_numbers = #tpu.dot_dimension_numbers<[1], [0], [0], [1], [0, 0, 1, 1], [], []>} : vector<8x8xbf16>, vector<8x8xbf16>, vector<8x8xf32> -> vector<8x8xf32>
    %42 = vector.broadcast %17 : vector<1x8xf32> to vector<8x8xf32>
    %43 = arith.addf %41, %42 : vector<8x8xf32>
    %cst_16 = arith.constant dense<0xFF800000> : vector<8xf32>
    %44 = vector.multi_reduction <maximumf>, %43, %cst_16 [1] : vector<8x8xf32> to vector<8xf32>
    %45 = vector.shape_cast %44 : vector<8xf32> to vector<8x1xf32>
    %46 = vector.broadcast %45 : vector<8x1xf32> to vector<8x8xf32>
    %47 = arith.subf %43, %46 : vector<8x8xf32>
    %48 = math.exp %47 : vector<8x8xf32>
    %cst_17 = arith.constant dense<0.000000e+00> : vector<8xf32>
    %49 = vector.multi_reduction <add>, %48, %cst_17 [1] : vector<8x8xf32> to vector<8xf32>
    %50 = vector.shape_cast %49 : vector<8xf32> to vector<8x1xf32>
    %51 = tpu.reciprocal %50 {approx = true} : vector<8x1xf32> -> vector<8x1xf32>
    %52 = vector.broadcast %51 : vector<8x1xf32> to vector<8x8xf32>
    %53 = arith.mulf %48, %52 : vector<8x8xf32>
    %54 = arith.truncf %53 : vector<8x8xf32> to vector<8x8xbf16>
    %cst_18 = arith.constant dense<0.000000e+00> : vector<8x8xf32>
    %55 = tpu.matmul %54, %39, %cst_18 {dimension_numbers = #tpu.dot_dimension_numbers<[1], [0], [0], [1], [0, 0, 1, 1], [], []>} : vector<8x8xbf16>, vector<8x8xbf16>, vector<8x8xf32> -> vector<8x8xf32>
    %56 = vector.extract_strided_slice %14 {offsets = [0, 16], sizes = [8, 8], strides = [1, 1]} : vector<8x32xbf16> to vector<8x8xbf16>
    %57 = vector.extract_strided_slice %15 {offsets = [0, 16], sizes = [8, 8], strides = [1, 1]} : vector<8x32xbf16> to vector<8x8xbf16>
    %58 = vector.extract_strided_slice %16 {offsets = [0, 16], sizes = [8, 8], strides = [1, 1]} : vector<8x32xbf16> to vector<8x8xbf16>
    %59 = tpu.transpose %57, [1, 0] : vector<8x8xbf16> -> vector<8x8xbf16>
    %cst_19 = arith.constant dense<0.000000e+00> : vector<8x8xf32>
    %60 = tpu.matmul %56, %59, %cst_19 {dimension_numbers = #tpu.dot_dimension_numbers<[1], [0], [0], [1], [0, 0, 1, 1], [], []>} : vector<8x8xbf16>, vector<8x8xbf16>, vector<8x8xf32> -> vector<8x8xf32>
    %61 = vector.broadcast %17 : vector<1x8xf32> to vector<8x8xf32>
    %62 = arith.addf %60, %61 : vector<8x8xf32>
    %cst_20 = arith.constant dense<0xFF800000> : vector<8xf32>
    %63 = vector.multi_reduction <maximumf>, %62, %cst_20 [1] : vector<8x8xf32> to vector<8xf32>
    %64 = vector.shape_cast %63 : vector<8xf32> to vector<8x1xf32>
    %65 = vector.broadcast %64 : vector<8x1xf32> to vector<8x8xf32>
    %66 = arith.subf %62, %65 : vector<8x8xf32>
    %67 = math.exp %66 : vector<8x8xf32>
    %cst_21 = arith.constant dense<0.000000e+00> : vector<8xf32>
    %68 = vector.multi_reduction <add>, %67, %cst_21 [1] : vector<8x8xf32> to vector<8xf32>
    %69 = vector.shape_cast %68 : vector<8xf32> to vector<8x1xf32>
    %70 = tpu.reciprocal %69 {approx = true} : vector<8x1xf32> -> vector<8x1xf32>
    %71 = vector.broadcast %70 : vector<8x1xf32> to vector<8x8xf32>
    %72 = arith.mulf %67, %71 : vector<8x8xf32>
    %73 = arith.truncf %72 : vector<8x8xf32> to vector<8x8xbf16>
    %cst_22 = arith.constant dense<0.000000e+00> : vector<8x8xf32>
    %74 = tpu.matmul %73, %58, %cst_22 {dimension_numbers = #tpu.dot_dimension_numbers<[1], [0], [0], [1], [0, 0, 1, 1], [], []>} : vector<8x8xbf16>, vector<8x8xbf16>, vector<8x8xf32> -> vector<8x8xf32>
    %75 = vector.extract_strided_slice %14 {offsets = [0, 24], sizes = [8, 8], strides = [1, 1]} : vector<8x32xbf16> to vector<8x8xbf16>
    %76 = vector.extract_strided_slice %15 {offsets = [0, 24], sizes = [8, 8], strides = [1, 1]} : vector<8x32xbf16> to vector<8x8xbf16>
    %77 = vector.extract_strided_slice %16 {offsets = [0, 24], sizes = [8, 8], strides = [1, 1]} : vector<8x32xbf16> to vector<8x8xbf16>
    %78 = tpu.transpose %76, [1, 0] : vector<8x8xbf16> -> vector<8x8xbf16>
    %cst_23 = arith.constant dense<0.000000e+00> : vector<8x8xf32>
    %79 = tpu.matmul %75, %78, %cst_23 {dimension_numbers = #tpu.dot_dimension_numbers<[1], [0], [0], [1], [0, 0, 1, 1], [], []>} : vector<8x8xbf16>, vector<8x8xbf16>, vector<8x8xf32> -> vector<8x8xf32>
    %80 = vector.broadcast %17 : vector<1x8xf32> to vector<8x8xf32>
    %81 = arith.addf %79, %80 : vector<8x8xf32>
    %cst_24 = arith.constant dense<0xFF800000> : vector<8xf32>
    %82 = vector.multi_reduction <maximumf>, %81, %cst_24 [1] : vector<8x8xf32> to vector<8xf32>
    %83 = vector.shape_cast %82 : vector<8xf32> to vector<8x1xf32>
    %84 = vector.broadcast %83 : vector<8x1xf32> to vector<8x8xf32>
    %85 = arith.subf %81, %84 : vector<8x8xf32>
    %86 = math.exp %85 : vector<8x8xf32>
    %cst_25 = arith.constant dense<0.000000e+00> : vector<8xf32>
    %87 = vector.multi_reduction <add>, %86, %cst_25 [1] : vector<8x8xf32> to vector<8xf32>
    %88 = vector.shape_cast %87 : vector<8xf32> to vector<8x1xf32>
    %89 = tpu.reciprocal %88 {approx = true} : vector<8x1xf32> -> vector<8x1xf32>
    %90 = vector.broadcast %89 : vector<8x1xf32> to vector<8x8xf32>
    %91 = arith.mulf %86, %90 : vector<8x8xf32>
    %92 = arith.truncf %91 : vector<8x8xf32> to vector<8x8xbf16>
    %cst_26 = arith.constant dense<0.000000e+00> : vector<8x8xf32>
    %93 = tpu.matmul %92, %77, %cst_26 {dimension_numbers = #tpu.dot_dimension_numbers<[1], [0], [0], [1], [0, 0, 1, 1], [], []>} : vector<8x8xbf16>, vector<8x8xbf16>, vector<8x8xf32> -> vector<8x8xf32>
    %94 = tpu.concatenate %36, %55, %74, %93 in 1 : vector<8x8xf32>, vector<8x8xf32>, vector<8x8xf32>, vector<8x8xf32> -> vector<8x32xf32>
    %c0_27 = arith.constant 0 : index
    %c0_28 = arith.constant 0 : index
    %95 = vector.load %arg16[%c0_27, %c0_28] : memref<8x32xf32, #tpu.memory_space<vmem>>, vector<8x32xf32>
    tpu.vector_store %arg16[%c0_27, %c0_28], %94 {strides = array<i32>} : memref<8x32xf32, #tpu.memory_space<vmem>>, vector<8x32xf32>,
    %c0_29 = arith.constant 0 : index
    %c0_30 = arith.constant 0 : index
    %96 = vector.load %arg16[%c0_29, %c0_30] : memref<8x32xf32, #tpu.memory_space<vmem>>, vector<8x32xf32>
    %97 = arith.truncf %96 : vector<8x32xf32> to vector<8x32xbf16>
    %c0_31 = arith.constant 0 : index
    %c0_32 = arith.constant 0 : index
    %98 = vector.load %arg5[%c0_31, %c0_32] : memref<32x32xbf16, #tpu.memory_space<vmem>>, vector<32x32xbf16>
    %cst_33 = arith.constant dense<0.000000e+00> : vector<8x32xf32>
    %99 = tpu.matmul %97, %98, %cst_33 {dimension_numbers = #tpu.dot_dimension_numbers<[1], [0], [0], [1], [0, 0, 1, 1], [], []>} : vector<8x32xbf16>, vector<32x32xbf16>, vector<8x32xf32> -> vector<8x32xf32>
    %c0_34 = arith.constant 0 : index
    %c0_35 = arith.constant 0 : index
    %100 = vector.load %arg6[%c0_34, %c0_35] : memref<1x32xf32, #tpu.memory_space<vmem>>, vector<1x32xf32>
    %101 = vector.broadcast %100 : vector<1x32xf32> to vector<8x32xf32>
    %102 = arith.addf %99, %101 : vector<8x32xf32>
    %103 = arith.addf %1, %102 : vector<8x32xf32>
    %c0_36 = arith.constant 0 : index
    %c0_37 = arith.constant 0 : index
    %104 = vector.load %arg7[%c0_36, %c0_37] : memref<1x32xf32, #tpu.memory_space<vmem>>, vector<1x32xf32>
    %c0_38 = arith.constant 0 : index
    %c0_39 = arith.constant 0 : index
    %105 = vector.load %arg8[%c0_38, %c0_39] : memref<1x32xf32, #tpu.memory_space<vmem>>, vector<1x32xf32>
    %cst_40 = arith.constant dense<0.000000e+00> : vector<8xf32>
    %106 = vector.multi_reduction <add>, %103, %cst_40 [1] : vector<8x32xf32> to vector<8xf32>
    %107 = vector.shape_cast %106 : vector<8xf32> to vector<8x1xf32>
    %cst_41 = arith.constant 3.200000e+01 : f32
    %108 = vector.broadcast %cst_41 : f32 to vector<8x1xf32>
    %109 = arith.divf %107, %108 : vector<8x1xf32>
    %110 = vector.broadcast %109 : vector<8x1xf32> to vector<8x32xf32>
    %111 = arith.subf %103, %110 : vector<8x32xf32>
    %112 = arith.mulf %111, %111 : vector<8x32xf32>
    %cst_42 = arith.constant dense<0.000000e+00> : vector<8xf32>
    %113 = vector.multi_reduction <add>, %112, %cst_42 [1] : vector<8x32xf32> to vector<8xf32>
    %114 = vector.shape_cast %113 : vector<8xf32> to vector<8x1xf32>
    %cst_43 = arith.constant 3.200000e+01 : f32
    %115 = vector.broadcast %cst_43 : f32 to vector<8x1xf32>
    %116 = arith.divf %114, %115 : vector<8x1xf32>
    %117 = vector.broadcast %109 : vector<8x1xf32> to vector<8x32xf32>
    %118 = arith.subf %103, %117 : vector<8x32xf32>
    %cst_44 = arith.constant 9.99999974E-6 : f32
    %119 = vector.broadcast %cst_44 : f32 to vector<8x1xf32>
    %120 = arith.addf %116, %119 : vector<8x1xf32>
    %121 = math.rsqrt %120 : vector<8x1xf32>
    %122 = vector.broadcast %121 : vector<8x1xf32> to vector<8x32xf32>
    %123 = arith.mulf %118, %122 : vector<8x32xf32>
    %124 = vector.broadcast %104 : vector<1x32xf32> to vector<8x32xf32>
    %125 = arith.mulf %123, %124 : vector<8x32xf32>
    %126 = vector.broadcast %105 : vector<1x32xf32> to vector<8x32xf32>
    %127 = arith.addf %125, %126 : vector<8x32xf32>
    %128 = arith.truncf %127 : vector<8x32xf32> to vector<8x32xbf16>
    %c0_45 = arith.constant 0 : index
    %c0_46 = arith.constant 0 : index
    %129 = vector.load %arg9[%c0_45, %c0_46] : memref<32x64xbf16, #tpu.memory_space<vmem>>, vector<32x64xbf16>
    %cst_47 = arith.constant dense<0.000000e+00> : vector<8x64xf32>
    %130 = tpu.matmul %128, %129, %cst_47 {dimension_numbers = #tpu.dot_dimension_numbers<[1], [0], [0], [1], [0, 0, 1, 1], [], []>} : vector<8x32xbf16>, vector<32x64xbf16>, vector<8x64xf32> -> vector<8x64xf32>
    %c0_48 = arith.constant 0 : index
    %c0_49 = arith.constant 0 : index
    %131 = vector.load %arg10[%c0_48, %c0_49] : memref<1x64xf32, #tpu.memory_space<vmem>>, vector<1x64xf32>
    %132 = vector.broadcast %131 : vector<1x64xf32> to vector<8x64xf32>
    %133 = arith.addf %130, %132 : vector<8x64xf32>
    %cst_50 = arith.constant 0.000000e+00 : f32
    %134 = vector.broadcast %cst_50 : f32 to vector<8x64xf32>
    %135 = arith.maximumf %133, %134 : vector<8x64xf32>
    %136 = arith.truncf %135 : vector<8x64xf32> to vector<8x64xbf16>
    %c0_51 = arith.constant 0 : index
    %c0_52 = arith.constant 0 : index
    %137 = vector.load %arg11[%c0_51, %c0_52] : memref<64x32xbf16, #tpu.memory_space<vmem>>, vector<64x32xbf16>
    %cst_53 = arith.constant dense<0.000000e+00> : vector<8x32xf32>
    %138 = tpu.matmul %136, %137, %cst_53 {dimension_numbers = #tpu.dot_dimension_numbers<[1], [0], [0], [1], [0, 0, 1, 1], [], []>} : vector<8x64xbf16>, vector<64x32xbf16>, vector<8x32xf32> -> vector<8x32xf32>
    %c0_54 = arith.constant 0 : index
    %c0_55 = arith.constant 0 : index
    %139 = vector.load %arg12[%c0_54, %c0_55] : memref<1x32xf32, #tpu.memory_space<vmem>>, vector<1x32xf32>
    %140 = vector.broadcast %139 : vector<1x32xf32> to vector<8x32xf32>
    %141 = arith.addf %138, %140 : vector<8x32xf32>
    %142 = arith.addf %127, %141 : vector<8x32xf32>
    %c0_56 = arith.constant 0 : index
    %c0_57 = arith.constant 0 : index
    %143 = vector.load %arg13[%c0_56, %c0_57] : memref<1x32xf32, #tpu.memory_space<vmem>>, vector<1x32xf32>
    %c0_58 = arith.constant 0 : index
    %c0_59 = arith.constant 0 : index
    %144 = vector.load %arg14[%c0_58, %c0_59] : memref<1x32xf32, #tpu.memory_space<vmem>>, vector<1x32xf32>
    %cst_60 = arith.constant dense<0.000000e+00> : vector<8xf32>
    %145 = vector.multi_reduction <add>, %142, %cst_60 [1] : vector<8x32xf32> to vector<8xf32>
    %146 = vector.shape_cast %145 : vector<8xf32> to vector<8x1xf32>
    %cst_61 = arith.constant 3.200000e+01 : f32
    %147 = vector.broadcast %cst_61 : f32 to vector<8x1xf32>
    %148 = arith.divf %146, %147 : vector<8x1xf32>
    %149 = vector.broadcast %148 : vector<8x1xf32> to vector<8x32xf32>
    %150 = arith.subf %142, %149 : vector<8x32xf32>
    %151 = arith.mulf %150, %150 : vector<8x32xf32>
    %cst_62 = arith.constant dense<0.000000e+00> : vector<8xf32>
    %152 = vector.multi_reduction <add>, %151, %cst_62 [1] : vector<8x32xf32> to vector<8xf32>
    %153 = vector.shape_cast %152 : vector<8xf32> to vector<8x1xf32>
    %cst_63 = arith.constant 3.200000e+01 : f32
    %154 = vector.broadcast %cst_63 : f32 to vector<8x1xf32>
    %155 = arith.divf %153, %154 : vector<8x1xf32>
    %156 = vector.broadcast %148 : vector<8x1xf32> to vector<8x32xf32>
    %157 = arith.subf %142, %156 : vector<8x32xf32>
    %cst_64 = arith.constant 9.99999974E-6 : f32
    %158 = vector.broadcast %cst_64 : f32 to vector<8x1xf32>
    %159 = arith.addf %155, %158 : vector<8x1xf32>
    %160 = math.rsqrt %159 : vector<8x1xf32>
    %161 = vector.broadcast %160 : vector<8x1xf32> to vector<8x32xf32>
    %162 = arith.mulf %157, %161 : vector<8x32xf32>
    %163 = vector.broadcast %143 : vector<1x32xf32> to vector<8x32xf32>
    %164 = arith.mulf %162, %163 : vector<8x32xf32>
    %165 = vector.broadcast %144 : vector<1x32xf32> to vector<8x32xf32>
    %166 = arith.addf %164, %165 : vector<8x32xf32>
    %167 = vector.shape_cast %166 : vector<8x32xf32> to vector<1x8x32xf32>
    %c0_65 = arith.constant 0 : index
    %c0_66 = arith.constant 0 : index
    %c0_67 = arith.constant 0 : index
    %168 = vector.load %arg15[%c0_65, %c0_66, %c0_67] : memref<1x8x32xf32, #tpu.memory_space<vmem>>, vector<1x8x32xf32>
    tpu.vector_store %arg15[%c0_65, %c0_66, %c0_67], %167 {strides = array<i32>} : memref<1x8x32xf32, #tpu.memory_space<vmem>>, vector<1x8x32xf32>,
    return
  }
  func.func @transform_0(%arg0: i32) -> (i32, i32, i32) {
    %c0_i32 = arith.constant 0 : i32
    %c0_i32_0 = arith.constant 0 : i32
    %c0_i32_1 = arith.constant 0 : i32
    return %arg0, %c0_i32, %c0_i32_0 : i32, i32, i32
  }
  func.func @transform_1(%arg0: i32) -> (i32, i32, i32) {
    %c0_i32 = arith.constant 0 : i32
    %c0_i32_0 = arith.constant 0 : i32
    %c0_i32_1 = arith.constant 0 : i32
    return %arg0, %c0_i32, %c0_i32_0 : i32, i32, i32
  }
  func.func @transform_2(%arg0: i32) -> (i32, i32) {
    %c0_i32 = arith.constant 0 : i32
    %c0_i32_0 = arith.constant 0 : i32
    %c0_i32_1 = arith.constant 0 : i32
    return %c0_i32, %c0_i32_0 : i32, i32
  }
  func.func @transform_3(%arg0: i32) -> (i32, i32) {
    %c0_i32 = arith.constant 0 : i32
    %c0_i32_0 = arith.constant 0 : i32
    %c0_i32_1 = arith.constant 0 : i32
    return %c0_i32, %c0_i32_0 : i32, i32
  }
  func.func @transform_4(%arg0: i32) -> (i32, i32) {
    %c0_i32 = arith.constant 0 : i32
    %c0_i32_0 = arith.constant 0 : i32
    %c0_i32_1 = arith.constant 0 : i32
    return %c0_i32, %c0_i32_0 : i32, i32
  }
  func.func @transform_5(%arg0: i32) -> (i32, i32) {
    %c0_i32 = arith.constant 0 : i32
    %c0_i32_0 = arith.constant 0 : i32
    %c0_i32_1 = arith.constant 0 : i32
    return %c0_i32, %c0_i32_0 : i32, i32
  }
  func.func @transform_6(%arg0: i32) -> (i32, i32) {
    %c0_i32 = arith.constant 0 : i32
    %c0_i32_0 = arith.constant 0 : i32
    %c0_i32_1 = arith.constant 0 : i32
    return %c0_i32, %c0_i32_0 : i32, i32
  }
  func.func @transform_7(%arg0: i32) -> (i32, i32) {
    %c0_i32 = arith.constant 0 : i32
    %c0_i32_0 = arith.constant 0 : i32
    %c0_i32_1 = arith.constant 0 : i32
    return %c0_i32, %c0_i32_0 : i32, i32
  }
  func.func @transform_8(%arg0: i32) -> (i32, i32) {
    %c0_i32 = arith.constant 0 : i32
    %c0_i32_0 = arith.constant 0 : i32
    %c0_i32_1 = arith.constant 0 : i32
    return %c0_i32, %c0_i32_0 : i32, i32
  }
  func.func @transform_9(%arg0: i32) -> (i32, i32) {
    %c0_i32 = arith.constant 0 : i32
    %c0_i32_0 = arith.constant 0 : i32
    %c0_i32_1 = arith.constant 0 : i32
    return %c0_i32, %c0_i32_0 : i32, i32
  }
  func.func @transform_10(%arg0: i32) -> (i32, i32) {
    %c0_i32 = arith.constant 0 : i32
    %c0_i32_0 = arith.constant 0 : i32
    %c0_i32_1 = arith.constant 0 : i32
    return %c0_i32, %c0_i32_0 : i32, i32
  }
  func.func @transform_11(%arg0: i32) -> (i32, i32) {
    %c0_i32 = arith.constant 0 : i32
    %c0_i32_0 = arith.constant 0 : i32
    %c0_i32_1 = arith.constant 0 : i32
    return %c0_i32, %c0_i32_0 : i32, i32
  }
  func.func @transform_12(%arg0: i32) -> (i32, i32) {
    %c0_i32 = arith.constant 0 : i32
    %c0_i32_0 = arith.constant 0 : i32
    %c0_i32_1 = arith.constant 0 : i32
    return %c0_i32, %c0_i32_0 : i32, i32
  }
  func.func @transform_13(%arg0: i32) -> (i32, i32) {
    %c0_i32 = arith.constant 0 : i32
    %c0_i32_0 = arith.constant 0 : i32
    %c0_i32_1 = arith.constant 0 : i32
    return %c0_i32, %c0_i32_0 : i32, i32
  }
  func.func @transform_14(%arg0: i32) -> (i32, i32, i32) {
    %c0_i32 = arith.constant 0 : i32
    %c0_i32_0 = arith.constant 0 : i32
    %c0_i32_1 = arith.constant 0 : i32
    return %arg0, %c0_i32, %c0_i32_0 : i32, i32, i32
  }
}

</mosaic_0001>

<bundles_post_ra>
// kernel: tpu_custom_call.1
= control target key start
LH: loop header
LB: loop body
LE: loop exit
PB: predicated region body
PF: predicated region fallthrough
CT: control target
= control target key end

     0   :  { %s2138_s0 = inlined_call_operand.vmem [shape: f32[2,8,32], index: 0, kind: input, shape index: {}]   ;;  %s2139_s1 = inlined_call_operand.vmem [shape: f32[2,1,8], index: 1, kind: input, shape index: {}]   ;;  %s2140_s2 = inlined_call_operand.vmem [shape: bf16[32,96], index: 2, kind: input, shape index: {}]   ;;  %s2141_s3 = inlined_call_operand.vmem [shape: f32[1,96], index: 3, kind: input, shape index: {}]   ;;  %s2142_s4 = inlined_call_operand.vmem [shape: bf16[32,32], index: 4, kind: input, shape index: {}]   ;;  %s2143_s5 = inlined_call_operand.vmem [shape: f32[1,32], index: 5, kind: input, shape index: {}]   ;;  %s2144_s6 = inlined_call_operand.vmem [shape: f32[1,32], index: 6, kind: input, shape index: {}]   ;;  %s2145_s7 = inlined_call_operand.vmem [shape: f32[1,32], index: 7, kind: input, shape index: {}]   ;;  %s2146_s8 = inlined_call_operand.hbm [shape: bf16[32,64], index: 8, kind: input, shape index: {}]   ;;  %s2147_s9 = inlined_call_operand.vmem [shape: f32[1,64], index: 9, kind: input, shape index: {}]   ;;  %s2148_s10 = inlined_call_operand.vmem [shape: bf16[64,32], index: 10, kind: input, shape index: {}]   ;;  %s2149_s11 = inlined_call_operand.vmem [shape: f32[1,32], index: 11, kind: input, shape index: {}]   ;;  %s2150_s12 = inlined_call_operand.vmem [shape: f32[1,32], index: 12, kind: input, shape index: {}]   ;;  %s2151_s13 = inlined_call_operand.vmem [shape: f32[1,32], index: 13, kind: input, shape index: {}]   ;;  %s2152_s14 = inlined_call_operand.hbm [shape: f32[2,8,32], index: 14, kind: output, shape index: {}]  }
   0x1   :  { %2160 = sst [smem:[#allocation13_spill]] %s2138_s0 }
   0x2   :  { %19 = vsyncpa [#allocation4], 0 }
   0x3   :  { %20 = vsyncpa [#allocation5], 0 }
   0x4   :  { %22 = vsyncpa [#allocation5 + $0x1], 0  ;;  %s1853_s29 = smov 0   ;;  %s1855_s30 = smov 0  }
   0x5   :  { %s1857_s15 = smov 0   ;;  %s1859_s16 = smov 0  }
   0x6 LB: > { %2161 = sst [smem:[#allocation9_spill]] %s1752_s15  ;;  %s1874_s17 = sadd.s32 4294967295, %s1756_s16   ;;  %s1756_s16 = sphi %s1859_s16, %s2176_s16   ;;  %s1752_s15 = sphi %s1857_s15, %s2178_s15   ;;  %s1748_s30 = sphi %s1855_s30, %s2180_s30   ;;  %s1744_s29 = sphi %s1853_s29, %s2179_s29  }
   0x7   : > { %s1407_s18 = sadd.s32 4294967294, %s1756_s16   ;;  %s1878_s19 = sadd.s32 1, %s1756_s16  }
   0x8   : > { %2162 = sst [smem:[#allocation10_spill]] %s1878_s19  ;;  %s339_s20 = sadd.s32 1, %s1752_s15 }
   0x9   : > { %s336_s21 = ssub.s32 %s1756_s16, %s1878_s19  ;;  %p349_p0 = scmp.ne.s32.totalorder %s1752_s15, %s1748_s30 }
   0xa   : > { %p337_p1 = scmp.eq.s32.totalorder %s336_s21, 0  ;;  %p350_p2 = scmp.eq.s32.totalorder %s1874_s17, 1 }
   0xb   : > { %p355_p3 = scmp.ne.s32.totalorder %s1748_s30, %s1744_s29  ;;  %p356_p4 = scmp.eq.s32.totalorder %s1407_s18, 1 }
   0xc   : > { %s1889_s22 = scalar_select %p337_p1, %s1752_s15, %s339_s20  }
   0xd   : > { %p1891_p5 = por %p350_p2, %p349_p0  ;;  %p1895_p6 = por %p356_p4, %p355_p3 }
   0xe   : > { %2163 = sst [smem:[#allocation11_spill]] %s1889_s22  ;;  %p1408_p7 = scmp.ge.s32.totalorder %s1756_s16, 1 }
   0xf   : > { %s2164_s23 = scalar_select %p1891_p5, 1, 0 }
  0x10   : > { %s2165_s24 = scalar_select %p1895_p6, 1, 0 }
  0x11   : > { %p363_p8 = scmp.lt.s32.totalorder %s1756_s16, 3  ;;  %p2157_p9 = scmp.eq.s32.totalorder %s1874_s17, 0 }
  0x12   : > { %2166 = sst [smem:[#allocation12_spill]] %s2165_s24  ;;  %s1758_s26 = smov [#allocation3]  }
  0x13   : > { %p1902_p10 = pnand %p1408_p7, %p363_p8  ;;  %s393_s27 = sshll.u32 %s1758_s26, 4  ;;  %s394_s27 = int_to_ptr.vmem [resolvable:$true] %s393_s27 }
  0x14   : > { %s1662_s21 = scalar_lea.hbm %s2146_s8, 256 }
  0x15   : > { %s2167_s25 = scalar_select %p1902_p10, 1, 0 }
  0x16   : > { %p1570_p11 = pneg %p1902_p10  ;;  %p1663_p13 = scmp.ne.s32.totalorder %s2146_s8, %s1662_s21 }
  0x17   : > { %p1669_p3 = scmp.lt.u32.totalorder %s1662_s21, %s2146_s8 }
  0x18   : > { %p1910_p12 = pnand %p2157_p9, %p1570_p11 }
  0x1a   : > { %p1664_p0 = pneg %p1910_p12 }
  0x1c   : > { %p1665_p1 = pnand %p1664_p0, %p1663_p13 }
  0x1e   : > { %p1666_p2 = pneg %p1665_p1 }
  0x20   : > { %p1671_p4 = pnand %p1669_p3, %p1666_p2 }
  0x22   : > { %1674 = shalt.err (!%p1671_p4)
}
  0x23   : > { %s1675_s24 = scalar_lea.vmem %s394_s27, 256  ;;  %p1683_p9 = scmp.lt.s32.totalorder %s394_s27, %s394_s27 }
  0x24   : > { %p1676_p7 = scmp.ne.s32.totalorder %s394_s27, %s1675_s24  ;;  %p1684_p6 = scmp.lt.s32.totalorder %s1675_s24, %s1675_s24 }
  0x26   : > { %p1678_p8 = pnand %p1676_p7, %p1664_p0  ;;  %p1685_p5 = por %p1684_p6, %p1683_p9 }
  0x28   : > { %p1679_p11 = pneg %p1678_p8 }
  0x2a   : > { %p1686_p10 = pnand %p1685_p5, %p1679_p11 }
  0x2c   : > { %1689 = shalt.err (!%p1686_p10)
}
  0x2d   : > { %s1759_s15 = smov 64   ;;  %s1760_s22 = smov 4  }
  0x2e   : > { %1573 = dma.hbm_to_vmem [thread:$0]  (!%p1910_p12), %s2146_s8, 256, %s394_s27, [#allocation4], %s1759_s15, %s1759_s15, %s1760_s22  }
  0x2f   : > { %p2169_p13 = scmp.ne.s32.totalorder %s2167_s25, 0 }
  0x30   : > { %p2170_p1 = scmp.eq.s32.totalorder (!%p2169_p13), %s1874_s17, 0 }
  0x31   : > { %437 = sbr.rel (%p2169_p13) target bundleno = 2628 (0xa44), region = 76 }
  0x38   : > { %1735 = dma.done.wait (%p2170_p1), [#allocation4], 256   ;;  %p2171_p0 = pmov %p2170_p1 }
  0x39   : > { %p485_p5 = scmp.lt.s32.totalorder %s1874_s17, 1  ;;  %v1761_v0 = vmov 0.0   ;;  %vm1762_vm0 = vmmov 0   ;;  %s2172_s0 = sld [smem:[#allocation13_spill]]  ;;  %v1632_v1 = vld [vmem:[%s2140_s2] sm:$0xff]   ;;  %v1633_v2 = vld [vmem:[%s2140_s2 + $0x8] sm:$0xff]   ;;  %v567_v23 = vlaneseq }
  0x3a   : > { %1737 = vsyncadd (%p2171_p0), [#allocation4], 4294967040  ;;  %1480 = vmatprep.subr.bf16.mxu0 %v1761_v0  ;;  %1484 = vmatprep.mubr.msk.bf16.mxu0 %vm1762_vm0, %v1761_v0  ;;  %vm521_vm1 = vcmask 261120   ;;  %v1416_v5 = vld [vmem:[%s2141_s3] ss:$0 sm:$0xff]  ;;  %s1764_s25 = smov 96  }
  0x3b   : > { %s1941_s19 = scalar_select %p485_p5, %s1874_s17, 1  ;;  %1488 = vmatprep.subr.bf16.mxu1 %v1761_v0  ;;  %1490 = vmatprep.mubr.msk.bf16.mxu1 %vm1762_vm0, %v1761_v0  ;;  %vm575_vm2 = vcmask 64512   ;;  %v568_v26 = vshrl.u32 %v567_v23, 7  ;;  %vm639_vm3 = vcmask 1043456   ;;  %vm1026_vm4 = vcmask 130048  }
  0x3c   : > { %1481 = vmatpush3.bf16.msra.mxu0 %v1632_v1  ;;  %s1765_s27 = smov 80   ;;  %s1767_s21 = smov 72   ;;  %vm1028_vm5 = vcmask 195584   ;;  %vm1238_vm6 = vcmask 523264  }
  0x3d   : > { %s1414_s24 = sshll.u32 %s1941_s19, 3  ;;  %1482 = vmatprep.subr.bf16.mxu0 %v1761_v0  ;;  %s1768_s26 = smov 112   ;;  %v569_v28 = vsub.s32 0, %v568_v26 }
  0x3e   : > { %s1769_s15 = smov 104   ;;  %s491_s20 = scalar_lea.vmem %s2139_s1, %s1941_s19 }
  0x3f   : > { %s488_s28 = scalar_lea.vmem %s2172_s0, %s1414_s24  ;;  %s1763_s24 = smov 120   ;;  %v494_v24 = vld [vmem:[%s491_s20] sm:$0x1] }
  0x40   : > { %v1956_v3 = vld [vmem:[%s488_s28] sm:$0xff]  ;;  %1483 = vmatpush3.bf16.msra.mxu0 %v1633_v2  ;;  %s1766_s28 = smov 88   ;;  %v1415_v25 = vadd.f32 -1.0, %v494_v24  ;;  %s1770_s19 = smov 56  }
  0x41   : > { %v497_v4 = vpack.c.bf16 %v1956_v3, %v1956_v3  ;;  %1494 = vmatprep.subr.bf16.mxu0 %v1761_v0  ;;  %s1775_s18 = smov 16   ;;  %s1776_s20 = smov 24  }
  0x42   : > { %v496_v27 = vmul.f32 1e+09, %v1415_v25  ;;  %p2173_p9 = scmp.ne.s32.totalorder %s2164_s23, 0 }
  0x43   : > { %1485 = vmatmul.mubr.msk.bf16.vlgmr.msra.gmra.mrb[0].mxu0 %vm521_vm1, %v497_v4 }
  0x44   : > { %1496 = vmatprep.mubr.msk.bf16.mxu0 %vm1762_vm0, %v1761_v0  ;;  %v570_v29 = vrot.slane %v496_v27, %v569_v28 }
 0x116   : > { %v559_v6 = vpop.f32.mrb[0].mxu0 }
 0x117   : > { %v560_v7 = vadd.f32 %v1416_v5, %v559_v6  ;;  %v1486_v8 = vpop.f32.mrb[1].mxu0 }
 0x118   : > { %v562_v9 = vpop.f32.mrb[2].mxu0 }
 0x119   : > { %v1968_v10 = vpack.c.bf16 %v560_v7, %v560_v7  ;;  %v1487_v11 = vpop.f32.mrb[3].mxu0 }
 0x11b   : > { %683 = vrot.lane.b32.xlu1 %v1968_v10, %s1763_s24  ;;  %573 = vrot.lane.b32.xlu0 %v1968_v10, %s1764_s25  ;;  %s1771_s24 = smov 64   ;;  %s1772_s25 = smov 40  }
 0x11f   : > { %795 = vrot.lane.b32.xlu1 %v1968_v10, %s1765_s27  ;;  %685 = vrot.lane.b32.xlu0 %v1968_v10, %s1766_s28  ;;  %s1773_s27 = smov 48   ;;  %s1774_s28 = smov 8  }
 0x123   : > { %905 = vrot.lane.b32.xlu1 %v1968_v10, %s1767_s21  ;;  %793 = vrot.lane.b32.xlu0 %v1968_v10, %s1768_s26 }
 0x127   : > { %903 = vrot.lane.b32.xlu0 %v1968_v10, %s1769_s15  ;;  %s482_s15 = sand.u32 1, %s1748_s30  }
 0x128   : > { %s1413_s22 = sshll.u32 %s482_s15, 3 }
 0x18d   : > { %v574_v12 = vpop.permute.xlu0 %573  ;;  %v684_v15 = vpop.permute.xlu1 %683 }
 0x18e   : > { %v580_v13 = vsel %vm575_vm2, %v574_v12, 0 }
 0x18f   : > { %1489 = vmatpush3.bf16.xpose.msra.mxu1 %v580_v13 }
 0x190   : > { %1500 = vmatprep.subr.bf16.mxu1 %v1761_v0 }
 0x191   : > { %v686_v14 = vpop.permute.xlu0 %685  ;;  %v796_v17 = vpop.permute.xlu1 %795 }
 0x192   : > { %v691_v16 = vsel %vm575_vm2, %v686_v14, 0  ;;  %v801_v18 = vsel %vm575_vm2, %v796_v17, 0 }
 0x195   : > { %v906_v19 = vpop.permute.xlu1 %905  ;;  %v794_v20 = vpop.permute.xlu0 %793 }
 0x196   : > { %1491 = vmatmul.mubr.msk.bf16.vlgmr.msra.gmra.mrb[0].mxu1 %vm575_vm2, %v1968_v10  ;;  %v911_v21 = vsel %vm575_vm2, %v906_v19, 0 }
 0x197   : > { %1501 = vmatpush3.bf16.xpose.msra.mxu1 %v691_v16  ;;  %1502 = vmatprep.mubr.msk.bf16.mxu1 %vm1762_vm0, %v1761_v0 }
 0x198   : > { %1512 = vmatprep.subr.bf16.mxu1 %v1761_v0 }
 0x199   : > { %v904_v22 = vpop.permute.xlu0 %903 }
 0x19e   : > { %1503 = vmatmul.mubr.msk.bf16.vlgmr.msra.gmra.mrb[4].mxu1 %vm575_vm2, %v684_v15 }
 0x19f   : > { %1513 = vmatpush3.bf16.xpose.msra.mxu1 %v801_v18  ;;  %1514 = vmatprep.mubr.msk.bf16.mxu1 %vm1762_vm0, %v1761_v0 }
 0x1a0   : > { %1524 = vmatprep.subr.bf16.mxu1 %v1761_v0 }
 0x1a6   : > { %1515 = vmatmul.mubr.msk.bf16.vlgmr.msra.gmra.mrb[8].mxu1 %vm575_vm2, %v794_v20 }
 0x1a7   : > { %1525 = vmatpush3.bf16.xpose.msra.mxu1 %v911_v21  ;;  %1526 = vmatprep.mubr.msk.bf16.mxu1 %vm1762_vm0, %v1761_v0 }
 0x1a8   : > { %1536 = vmatprep.subr.bf16.mxu1 %v1761_v0 }
 0x1ae   : > { %1527 = vmatmul.mubr.msk.bf16.vlgmr.msra.gmra.mrb[12].mxu1 %vm575_vm2, %v904_v22 }
 0x1af   : > { %1540 = vmatprep.mubr.msk.bf16.mxu1 %vm1762_vm0, %v1761_v0 }
 0x269   : > { %v616_v30 = vpop.f32.mrb[0].mxu1 }
 0x26a   : > { %v617_v31 = vadd.f32 %v616_v30, %v570_v29  ;;  %v1492_v32 = vpop.f32.mrb[1].mxu1 }
 0x26b   : > { %v619_v33 = vpop.f32.mrb[2].mxu1 }
 0x26c   : > { %v1493_v34 = vpop.f32.mrb[3].mxu1  ;;  %v622_v35 = vsel %vm575_vm2, %v617_v31, -inf }
 0x26d   : > { %623 = vmax.xlane.f32.xlu1 %v622_v35 }
 0x271   : > { %v727_v36 = vpop.f32.mrb[4].mxu1 }
 0x272   : > { %v728_v37 = vadd.f32 %v727_v36, %v570_v29  ;;  %v1504_v38 = vpop.f32.mrb[5].mxu1 }
 0x273   : > { %v730_v39 = vpop.f32.mrb[6].mxu1 }
 0x274   : > { %v1505_v40 = vpop.f32.mrb[7].mxu1  ;;  %v733_v41 = vsel %vm575_vm2, %v728_v37, -inf }
 0x275   : > { %734 = vmax.xlane.f32.xlu0 %v733_v41 }
 0x279   : > { %v837_v42 = vpop.f32.mrb[8].mxu1 }
 0x27a   : > { %v838_v43 = vadd.f32 %v837_v42, %v570_v29  ;;  %v1516_v44 = vpop.f32.mrb[9].mxu1 }
 0x27b   : > { %v840_v45 = vpop.f32.mrb[10].mxu1  ;;  %v1634_v44 = vld [vmem:[%s2142_s4] sm:$0xff]  }
 0x27c   : > { %v1517_v46 = vpop.f32.mrb[11].mxu1  ;;  %v843_v47 = vsel %vm575_vm2, %v838_v43, -inf  ;;  %1537 = vmatpush3.bf16.msra.mxu1 %v1634_v44  ;;  %v1635_v45 = vld [vmem:[%s2142_s4 + $0x8] sm:$0xff]  }
 0x27d   : > { %844 = vmax.xlane.f32.xlu0 %v843_v47  ;;  %1538 = vmatprep.subr.bf16.mxu1 %v1761_v0 }
 0x280   : > { %1539 = vmatpush3.bf16.msra.mxu1 %v1635_v45 }
 0x281   : > { %v947_v48 = vpop.f32.mrb[12].mxu1  ;;  %1552 = vmatprep.subr.bf16.mxu1 %v1761_v0 }
 0x282   : > { %v948_v49 = vadd.f32 %v947_v48, %v570_v29  ;;  %v1528_v50 = vpop.f32.mrb[13].mxu1 }
 0x283   : > { %v950_v51 = vpop.f32.mrb[14].mxu1 }
 0x284   : > { %v1529_v52 = vpop.f32.mrb[15].mxu1  ;;  %v953_v53 = vsel %vm575_vm2, %v948_v49, -inf }
 0x285   : > { %954 = vmax.xlane.f32.xlu1 %v953_v53 }
 0x2fa   : > { %v624_v54 = vpop.xlane.xlu1 %623 }
 0x2fb   : > { %v625_v55 = vsub.f32 %v617_v31, %v624_v54 }
 0x2fd   : > { %v626_v56 = vmul.f32 1.442695, %v625_v55 }
 0x2ff   : > { %1642 = vpow2.f32 %v626_v56 }
 0x302   : > { %v735_v57 = vpop.xlane.xlu0 %734 }
 0x303   : > { %v736_v58 = vsub.f32 %v728_v37, %v735_v57 }
 0x305   : > { %v737_v59 = vmul.f32 1.442695, %v736_v58 }
 0x307   : > { %1644 = vpow2.f32 %v737_v59 }
 0x309   : > { %v1643_v60 = vpop.eup %1642 }
 0x30a   : > { %v845_v61 = vpop.xlane.xlu0 %844  ;;  %v628_v62 = vsel %vm575_vm2, %v1643_v60, 0.0 }
 0x30b   : > { %v846_v63 = vsub.f32 %v838_v43, %v845_v61  ;;  %629 = vadd.xlane.f32.xlu0 %v628_v62  ;;  %v1428_v62 = vld [vmem:[%s2143_s5] ss:$0 sm:$0xff] }
 0x30d   : > { %v847_v1 = vmul.f32 1.442695, %v846_v63 }
 0x30f   : > { %1646 = vpow2.f32 %v847_v1 }
 0x311   : > { %v1645_v2 = vpop.eup %1644 }
 0x312   : > { %v739_v4 = vsel %vm575_vm2, %v1645_v2, 0.0  ;;  %v955_v7 = vpop.xlane.xlu1 %954 }
 0x313   : > { %740 = vadd.xlane.f32.xlu1 %v739_v4  ;;  %v956_v8 = vsub.f32 %v948_v49, %v955_v7 }
 0x315   : > { %v957_v9 = vmul.f32 1.442695, %v956_v8 }
 0x317   : > { %1648 = vpow2.f32 %v957_v9 }
 0x319   : > { %v1647_v5 = vpop.eup %1646 }
 0x31a   : > { %v849_v6 = vsel %vm575_vm2, %v1647_v5, 0.0 }
 0x31b   : > { %850 = vadd.xlane.f32.xlu0 %v849_v6 }
 0x321   : > { %v1649_v11 = vpop.eup %1648 }
 0x322   : > { %v959_v12 = vsel %vm575_vm2, %v1649_v11, 0.0 }
 0x324   : > { %745 = vrot.lane.b32.xlu1 %v1968_v10, %s1770_s19 }
 0x331   : > { %634 = vrot.lane.b32.xlu0 %v1968_v10, %s1771_s24 }
 0x335   : > { %965 = vrot.lane.b32.xlu0 %v1968_v10, %s1772_s25  ;;  %s1447_s25 = sshll.u32 %s1874_s17, 7  ;;  %s1777_s17 = smov [#allocation6]  }
 0x336   : > { %s2095_s0 = scalar_lea.hbm %s2152_s14, %s1447_s25 }
 0x348   : > { %960 = vadd.xlane.f32.xlu1 %v959_v12 }
 0x359   : > { %855 = vrot.lane.b32.xlu1 %v1968_v10, %s1773_s27  ;;  %s484_s27 = scalar_lea.vmem [#allocation6], %s1413_s22  ;;  %s1694_s22 = sshll.u32 %s1777_s17, 4  ;;  %s1695_s22 = int_to_ptr.vmem [resolvable:$false] %s1694_s22 }
 0x35a   : > { %s1696_s19 = scalar_lea.vmem %s1695_s22, 256 }
 0x398   : > { %v630_v13 = vpop.xlane.xlu0 %629 }
 0x399   : > { %1650 = vrcp.f32 %v630_v13 }
 0x3a0   : > { %v741_v14 = vpop.xlane.xlu1 %740 }
 0x3a1   : > { %1652 = vrcp.f32 %v741_v14  ;;  %v1636_v14 = vld [vmem:[#allocation3] sm:$0xff]  }
 0x3a3   : > { %v1651_v15 = vpop.eup %1650 }
 0x3a4   : > { %v632_v17 = vmul.f32 %v1651_v15, %v1643_v60  ;;  %v746_v20 = vpop.permute.xlu1 %745  ;;  %v1637_v15 = vld [vmem:[#allocation3 + $0x8] sm:$0xff]  }
 0x3a5   : > { %v751_v23 = vsel %vm639_vm3, %v746_v20, 0 }
 0x3a6   : > { %v633_v21 = vpack.c.bf16 %v632_v17, %v632_v17 }
 0x3a8   : > { %v851_v16 = vpop.xlane.xlu0 %850 }
 0x3a9   : > { %1654 = vrcp.f32 %v851_v16  ;;  %v1639_v16 = vld [vmem:[%s2148_s10 + $0x8] sm:$0xff]  }
 0x3ab   : > { %v1653_v22 = vpop.eup %1652 }
 0x3ac   : > { %v635_v18 = vpop.permute.xlu0 %634  ;;  %v743_v10 = vmul.f32 %v1653_v22, %v1645_v2 }
 0x3ad   : > { %v641_v19 = vsel %vm639_vm3, %v635_v18, 0 }
 0x3ae   : > { %1495 = vmatpush3.bf16.msra.mxu0 %v641_v19  ;;  %v744_v24 = vpack.c.bf16 %v743_v10, %v743_v10 }
 0x3af   : > { %1506 = vmatprep.subr.bf16.mxu0 %v1761_v0 }
 0x3b0   : > { %v966_v30 = vpop.permute.xlu0 %965 }
 0x3b1   : > { %1497 = vmatmul.mubr.msk.bf16.vlgmr.msra.gmra.mrb[4].mxu0 %vm575_vm2, %v633_v21  ;;  %v971_v32 = vsel %vm639_vm3, %v966_v30, 0  ;;  %v1432_v21 = vld [vmem:[%s2144_s6] ss:$0 sm:$0xff] }
 0x3b2   : > { %1507 = vmatpush3.bf16.msra.mxu0 %v751_v23  ;;  %1508 = vmatprep.mubr.msk.bf16.mxu0 %vm1762_vm0, %v1761_v0  ;;  %v1433_v23 = vld [vmem:[%s2145_s7] ss:$0 sm:$0xff] }
 0x3b3   : > { %1518 = vmatprep.subr.bf16.mxu0 %v1761_v0  ;;  %v1655_v25 = vpop.eup %1654 }
 0x3b4   : > { %v853_v27 = vmul.f32 %v1655_v25, %v1647_v5 }
 0x3b6   : > { %v854_v31 = vpack.c.bf16 %v853_v27, %v853_v27  ;;  %v1641_v27 = vld [vmem:[%s2148_s10 + $0x18] sm:$0xff]  }
 0x3b9   : > { %1509 = vmatmul.mubr.msk.bf16.vlgmr.msra.gmra.mrb[8].mxu0 %vm575_vm2, %v744_v24 }
 0x3ba   : > { %1520 = vmatprep.mubr.msk.bf16.mxu0 %vm1762_vm0, %v1761_v0 }
 0x3d5   : > { %v961_v26 = vpop.xlane.xlu1 %960 }
 0x3d6   : > { %1656 = vrcp.f32 %v961_v26  ;;  %v1640_v26 = vld [vmem:[%s2148_s10 + $0x10] sm:$0xff]  }
 0x3d9   : > { %v856_v28 = vpop.permute.xlu1 %855 }
 0x3da   : > { %v861_v29 = vsel %vm639_vm3, %v856_v28, 0  ;;  %v1434_v28 = vld [vmem:[%s2147_s9] ss:$0 sm:$0xff] }
 0x3db   : > { %1519 = vmatpush3.bf16.msra.mxu0 %v861_v29 }
 0x3dc   : > { %1530 = vmatprep.subr.bf16.mxu0 %v1761_v0 }
 0x3de   : > { %1521 = vmatmul.mubr.msk.bf16.vlgmr.msra.gmra.mrb[12].mxu0 %vm575_vm2, %v854_v31 }
 0x3df   : > { %1531 = vmatpush3.bf16.msra.mxu0 %v971_v32  ;;  %1532 = vmatprep.mubr.msk.bf16.mxu0 %vm1762_vm0, %v1761_v0 }
 0x3e0   : > { %v1657_v33 = vpop.eup %1656  ;;  %1544 = vmatprep.subr.bf16.mxu0 %v1761_v0 }
 0x3e1   : > { %v963_v34 = vmul.f32 %v1657_v33, %v1649_v11 }
 0x3e3   : > { %v964_v35 = vpack.c.bf16 %v963_v34, %v963_v34 }
 0x3e6   : > { %1533 = vmatmul.mubr.msk.bf16.vlgmr.msra.gmra.mrb[16].mxu0 %vm575_vm2, %v964_v35 }
 0x3e7   : > { %1548 = vmatprep.mubr.msk.bf16.mxu0 %vm1762_vm0, %v1761_v0  ;;  %1545 = vmatpush3.bf16.msra.mxu0 %v1636_v14 }
 0x3e8   : > { %1546 = vmatprep.subr.bf16.mxu0 %v1761_v0 }
 0x3eb   : > { %1547 = vmatpush3.bf16.msra.mxu0 %v1637_v15 }
 0x484   : > { %v677_v36 = vpop.f32.mrb[4].mxu0 }
 0x485   : > { %v1498_v37 = vpop.f32.mrb[5].mxu0 }
 0x486   : > { %v680_v38 = vpop.f32.mrb[6].mxu0 }
 0x487   : > { %v1499_v39 = vpop.f32.mrb[7].mxu0 }
 0x48c   : > { %v787_v40 = vpop.f32.mrb[8].mxu0 }
 0x48d   : > { %1014 = vrot.lane.b32.xlu1 %v787_v40, %s1774_s28  ;;  %v1510_v41 = vpop.f32.mrb[9].mxu0  ;;  %s1327_s28 = sshll.u32 %s484_s27, 4  ;;  %s2097_s28 = int_to_ptr.vmem [resolvable:$true] %s1327_s28 }
 0x48e   : > { %v790_v42 = vpop.f32.mrb[10].mxu0  ;;  %p1697_p2 = scmp.lt.s32.totalorder %s2097_s28, %s1695_s22 }
 0x48f   : > { %v1511_v43 = vpop.f32.mrb[11].mxu0 }
 0x4b1   : > { %v897_v46 = vpop.f32.mrb[12].mxu0 }
 0x4b2   : > { %1018 = vrot.lane.b32.xlu0 %v897_v46, %s1775_s18  ;;  %v1522_v47 = vpop.f32.mrb[13].mxu0  ;;  %s1314_s18 = scalar_lea.sflag [#allocation5], %s482_s15 }
 0x4b3   : > { %v900_v48 = vpop.f32.mrb[14].mxu0 }
 0x4b4   : > { %v1523_v49 = vpop.f32.mrb[15].mxu0 }
 0x4b9   : > { %v1007_v50 = vpop.f32.mrb[16].mxu0 }
 0x4ba   : > { %1022 = vrot.lane.b32.xlu1 %v1007_v50, %s1776_s20  ;;  %v1534_v51 = vpop.f32.mrb[17].mxu0  ;;  %s1690_s20 = scalar_lea.vmem %s2097_s28, 128 }
 0x4bb   : > { %v1010_v52 = vpop.f32.mrb[18].mxu0  ;;  %p1691_p6 = scmp.ne.s32.totalorder %s2097_s28, %s1690_s20  ;;  %p1698_p3 = scmp.lt.s32.totalorder %s1696_s19, %s1690_s20 }
 0x4bc   : > { %v1535_v53 = vpop.f32.mrb[19].mxu0  ;;  %v1444_v52 = vld [vmem:[%s2150_s12] ss:$0 sm:$0xff] }
 0x4bd   : > { %p1692_p10 = pnand %p1691_p6, %p2173_p9  ;;  %p1699_p4 = por %p1698_p3, %p1697_p2 }
 0x4bf   : > { %p1693_p12 = pneg %p1692_p10 }
 0x4c1   : > { %p1700_p7 = pnand %p1699_p4, %p1693_p12 }
 0x4ff   : > { %v1015_v54 = vpop.permute.xlu1 %1014 }
 0x500   : > { %v1025_v56 = vsel %vm575_vm2, %v677_v36, %v1015_v54  ;;  %v1445_v54 = vld [vmem:[%s2151_s13] ss:$0 sm:$0xff] }
 0x524   : > { %v1019_v55 = vpop.permute.xlu0 %1018 }
 0x525   : > { %v1027_v57 = vsel %vm1026_vm4, %v1025_v56, %v1019_v55 }
 0x52c   : > { %v1023_v58 = vpop.permute.xlu1 %1022 }
 0x52d   : > { %v1029_v59 = vsel %vm1028_vm5, %v1027_v57, %v1023_v58 }
 0x52e   : > { %1030 = vst.msk [vmem:[#allocation2] sm:$0xff] %vm521_vm1, %v1029_v59 }
 0x535   : > { %v1031_v60 = vld [vmem:[#allocation2] sm:$0xff] }
 0x536   : > { %v1032_v61 = vpack.c.bf16 %v1031_v60, %v1031_v60 }
 0x538   : > { %1541 = vmatmul.mubr.msk.bf16.vlgmr.msra.gmra.mrb[16].mxu1 %vm521_vm1, %v1032_v61 }
 0x539   : > { %1560 = vmatprep.mubr.msk.bf16.mxu1 %vm1762_vm0, %v1761_v0 }
 0x60b   : > { %v1093_v63 = vpop.f32.mrb[16].mxu1 }
 0x60c   : > { %v1094_v1 = vadd.f32 %v1428_v62, %v1093_v63  ;;  %v1542_v2 = vpop.f32.mrb[17].mxu1 }
 0x60d   : > { %v1096_v4 = vpop.f32.mrb[18].mxu1 }
 0x60e   : > { %v1543_v5 = vpop.f32.mrb[19].mxu1  ;;  %v1099_v6 = vadd.f32 %v1094_v1, %v1956_v3  ;;  %v1638_v3 = vld [vmem:[%s2148_s10] sm:$0xff]  }
 0x60f   : > { %1553 = vmatpush3.bf16.msra.mxu1 %v1638_v3 }
 0x610   : > { %v1102_v7 = vsel %vm521_vm1, %v1099_v6, 0.0  ;;  %1554 = vmatprep.subr.bf16.mxu1 %v1761_v0 }
 0x611   : > { %1103 = vadd.xlane.f32.xlu0 %v1102_v7 }
 0x613   : > { %1555 = vmatpush3.bf16.msra.mxu1 %v1639_v16 }
 0x614   : > { %1556 = vmatprep.subr.bf16.mxu1 %v1761_v0 }
 0x617   : > { %1557 = vmatpush3.bf16.msra.mxu1 %v1640_v26 }
 0x618   : > { %1558 = vmatprep.subr.bf16.mxu1 %v1761_v0  ;;  %v1438_v0 = vld [vmem:[%s2149_s11] ss:$0 sm:$0xff] }
 0x61b   : > { %1559 = vmatpush3.bf16.msra.mxu1 %v1641_v27 }
 0x69e   : > { %v1104_v8 = vpop.xlane.xlu0 %1103 }
 0x69f   : > { %v1106_v9 = vmul.f32 0.03125, %v1104_v8 }
 0x6a1   : > { %v1107_v11 = vsub.f32 %v1099_v6, %v1106_v9 }
 0x6a3   : > { %v1108_v12 = vmul.f32 %v1107_v11, %v1107_v11 }
 0x6a5   : > { %v1109_v13 = vsel %vm521_vm1, %v1108_v12, 0.0 }
 0x6a6   : > { %1110 = vadd.xlane.f32.xlu1 %v1109_v13 }
 0x733   : > { %v1111_v17 = vpop.xlane.xlu1 %1110 }
 0x734   : > { %v1112_v18 = vmul.f32 0.03125, %v1111_v17 }
 0x736   : > { %v1113_v19 = vadd.f32 1e-05, %v1112_v18 }
 0x738   : > { %1658 = vrsqrt.f32 %v1113_v19 }
 0x742   : > { %v1659_v20 = vpop.eup %1658 }
 0x743   : > { %v1115_v22 = vmul.f32 %v1659_v20, %v1107_v11 }
 0x745   : > { %v1122_v10 = vmul.f32 %v1432_v21, %v1115_v22 }
 0x747   : > { %v1129_v24 = vadd.f32 %v1433_v23, %v1122_v10 }
 0x749   : > { %v1130_v25 = vpack.c.bf16 %v1129_v24, %v1129_v24 }
 0x74b   : > { %1549 = vmatmul.mubr.msk.bf16.vlgmr.msra.gmra.mrb[20].mxu0 %vm521_vm1, %v1130_v25 }
 0x81e   : > { %v1191_v29 = vpop.f32.mrb[20].mxu0 }
 0x81f   : > { %v1192_v30 = vadd.f32 %v1434_v28, %v1191_v29  ;;  %v1550_v31 = vpop.f32.mrb[21].mxu0 }
 0x820   : > { %v1194_v32 = vpop.f32.mrb[22].mxu0 }
 0x821   : > { %v1197_v33 = vmax.f32 %v1192_v30, 0.0  ;;  %v1551_v34 = vpop.f32.mrb[23].mxu0 }
 0x823   : > { %v1198_v35 = vpack.c.bf16 %v1197_v33, %v1197_v33 }
 0x825   : > { %1561 = vmatmul.mubr.msk.bf16.vlgmr.msra.gmra.mrb[20].mxu1 %vm1238_vm6, %v1198_v35 }
 0x8f8   : > { %v1276_v36 = vpop.f32.mrb[20].mxu1 }
 0x8f9   : > { %v1277_v37 = vadd.f32 %v1438_v0, %v1276_v36  ;;  %v1562_v38 = vpop.f32.mrb[21].mxu1 }
 0x8fa   : > { %v1279_v39 = vpop.f32.mrb[22].mxu1 }
 0x8fb   : > { %v1563_v40 = vpop.f32.mrb[23].mxu1  ;;  %v1282_v41 = vadd.f32 %v1277_v37, %v1129_v24 }
 0x8fd   : > { %v1285_v42 = vsel %vm521_vm1, %v1282_v41, 0.0 }
 0x8fe   : > { %1286 = vadd.xlane.f32.xlu0 %v1285_v42 }
 0x98b   : > { %v1287_v43 = vpop.xlane.xlu0 %1286 }
 0x98c   : > { %v1288_v44 = vmul.f32 0.03125, %v1287_v43 }
 0x98e   : > { %v1289_v45 = vsub.f32 %v1282_v41, %v1288_v44 }
 0x990   : > { %v1290_v46 = vmul.f32 %v1289_v45, %v1289_v45 }
 0x992   : > { %v1291_v47 = vsel %vm521_vm1, %v1290_v46, 0.0 }
 0x993   : > { %1292 = vadd.xlane.f32.xlu0 %v1291_v47 }
 0xa20   : > { %v1293_v48 = vpop.xlane.xlu0 %1292 }
 0xa21   : > { %v1294_v49 = vmul.f32 0.03125, %v1293_v48 }
 0xa23   : > { %v1295_v50 = vadd.f32 1e-05, %v1294_v49 }
 0xa25   : > { %1660 = vrsqrt.f32 %v1295_v50 }
 0xa2f   : > { %v1661_v51 = vpop.eup %1660 }
 0xa30   : > { %v1297_v53 = vmul.f32 %v1661_v51, %v1289_v45 }
 0xa32   : > { %v1304_v55 = vmul.f32 %v1444_v52, %v1297_v53 }
 0xa34   : > { %v1311_v56 = vadd.f32 %v1445_v54, %v1304_v55 }
 0xa36   : > { %1312 = vst.msk [vmem:[%s484_s27] sm:$0xff] %vm521_vm1, %v1311_v56 }
 0xa37   : > { %1703 = shalt.err (!%p1700_p7)
}
 0xa38   : > { %s1704_s15 = scalar_lea.hbm %s2095_s0, 128  ;;  %s1708_s27 = scalar_lea.hbm %s2152_s14, 256 }
 0xa39   : > { %p1705_p8 = scmp.ne.s32.totalorder %s2095_s0, %s1704_s15  ;;  %p1709_p1 = scmp.lt.u32.totalorder %s2095_s0, %s2152_s14 }
 0xa3a   : > { %p1710_p0 = scmp.lt.u32.totalorder %s1708_s27, %s1704_s15  ;;  %p1712_p6 = scmp.lt.u32.totalorder %s1704_s15, %s2095_s0 }
 0xa3b   : > { %p1706_p11 = pnand %p1705_p8, %p2173_p9 }
 0xa3c   : > { %p1711_p5 = por %p1710_p0, %p1709_p1 }
 0xa3d   : > { %p1707_p13 = pneg %p1706_p11 }
 0xa3e   : > { %p1713_p10 = por %p1712_p6, %p1711_p5 }
 0xa40   : > { %p1714_p12 = pnand %p1713_p10, %p1707_p13 }
 0xa42   : > { %1717 = shalt.err (!%p1714_p12)
}
 0xa43   : > { %1568 = dma.vmem_to_hbm [thread:$0]  (%p2173_p9), %s2097_s28, 128, %s2095_s0, %s1314_s18  }
 0xa44 PF: > { %s2174_s20 = sld [smem:[#allocation12_spill]]  ;;  %p1580_p2 = scmp.ge.s32.totalorder %s1756_s16, 2 }
 0xa45   : > { %s1339_s17 = sand.u32 1, %s1744_s29  }
 0xa46   : > { %s1340_s22 = scalar_lea.sflag [#allocation5], %s1339_s17 }
 0xa4a   : > { %p2175_p3 = scmp.ne.s32.totalorder %s2174_s20, 0 }
 0xa4c   : > { %p1575_p4 = pnand %p1580_p2, %p2175_p3 }
 0xa4e   : > { %1739 = dma.done.wait (!%p1575_p4), %s1340_s22, 128  }
 0xa4f   : > { %1741 = vsyncadd (!%p1575_p4), %s1340_s22, 4294967168  ;;  %s2176_s16 = sld [smem:[#allocation10_spill]]  ;;  %s2177_s19 = sld [smem:[#allocation9_spill]] }
 0xa50   : > { %s2178_s15 = sld [smem:[#allocation11_spill]]  ;;  %s2179_s29 = smov %s1748_s30 }
 0xa55   : > { %p25_p7 = scmp.ge.s32.totalorder %s2176_s16, 4   ;;  %s2180_s30 = smov %s2177_s19 }
 0xa57   :  { %27 = sbr.rel (!%p25_p7) target bundleno = 6 (0x6), region = 119 }
 0xa5e   :  { %1345 = vsyncpa [#allocation4], 1 }
 0xa5f   :  { %1347 = vsyncpa [#allocation4 + $0x1], 1 }
 0xa60   :  { %1348 = vsyncpa [#allocation5], 1 }
 0xa61   :  { %1350 = vsyncpa [#allocation5 + $0x1], 1 }

// kernel: tpu_custom_call.1
= control target key start
LH: loop header
LB: loop body
LE: loop exit
PB: predicated region body
PF: predicated region fallthrough
CT: control target
= control target key end

     0   :  { %s2138_s0 = inlined_call_operand.vmem [shape: f32[2,8,32], index: 0, kind: input, shape index: {}]   ;;  %s2139_s1 = inlined_call_operand.vmem [shape: f32[2,1,8], index: 1, kind: input, shape index: {}]   ;;  %s2140_s2 = inlined_call_operand.vmem [shape: bf16[32,96], index: 2, kind: input, shape index: {}]   ;;  %s2141_s3 = inlined_call_operand.vmem [shape: f32[1,96], index: 3, kind: input, shape index: {}]   ;;  %s2142_s4 = inlined_call_operand.vmem [shape: bf16[32,32], index: 4, kind: input, shape index: {}]   ;;  %s2143_s5 = inlined_call_operand.vmem [shape: f32[1,32], index: 5, kind: input, shape index: {}]   ;;  %s2144_s6 = inlined_call_operand.vmem [shape: f32[1,32], index: 6, kind: input, shape index: {}]   ;;  %s2145_s7 = inlined_call_operand.vmem [shape: f32[1,32], index: 7, kind: input, shape index: {}]   ;;  %s2146_s8 = inlined_call_operand.hbm [shape: bf16[32,64], index: 8, kind: input, shape index: {}]   ;;  %s2147_s9 = inlined_call_operand.vmem [shape: f32[1,64], index: 9, kind: input, shape index: {}]   ;;  %s2148_s10 = inlined_call_operand.vmem [shape: bf16[64,32], index: 10, kind: input, shape index: {}]   ;;  %s2149_s11 = inlined_call_operand.vmem [shape: f32[1,32], index: 11, kind: input, shape index: {}]   ;;  %s2150_s12 = inlined_call_operand.vmem [shape: f32[1,32], index: 12, kind: input, shape index: {}]   ;;  %s2151_s13 = inlined_call_operand.vmem [shape: f32[1,32], index: 13, kind: input, shape index: {}]   ;;  %s2152_s14 = inlined_call_operand.hbm [shape: f32[2,8,32], index: 14, kind: output, shape index: {}]  }
   0x1   :  { %2160 = sst [smem:[#allocation13_spill]] %s2138_s0 }
   0x2   :  { %19 = vsyncpa [#allocation4], 0 }
   0x3   :  { %20 = vsyncpa [#allocation5], 0 }
   0x4   :  { %22 = vsyncpa [#allocation5 + $0x1], 0  ;;  %s1853_s29 = smov 0   ;;  %s1855_s30 = smov 0  }
   0x5   :  { %s1857_s15 = smov 0   ;;  %s1859_s16 = smov 0  }
   0x6 LB: > { %2161 = sst [smem:[#allocation9_spill]] %s1752_s15  ;;  %s1874_s17 = sadd.s32 4294967295, %s1756_s16   ;;  %s1756_s16 = sphi %s1859_s16, %s2176_s16   ;;  %s1752_s15 = sphi %s1857_s15, %s2178_s15   ;;  %s1748_s30 = sphi %s1855_s30, %s2180_s30   ;;  %s1744_s29 = sphi %s1853_s29, %s2179_s29  }
   0x7   : > { %s1407_s18 = sadd.s32 4294967294, %s1756_s16   ;;  %s1878_s19 = sadd.s32 1, %s1756_s16  }
   0x8   : > { %2162 = sst [smem:[#allocation10_spill]] %s1878_s19  ;;  %s339_s20 = sadd.s32 1, %s1752_s15 }
   0x9   : > { %s336_s21 = ssub.s32 %s1756_s16, %s1878_s19  ;;  %p349_p0 = scmp.ne.s32.totalorder %s1752_s15, %s1748_s30 }
   0xa   : > { %p337_p1 = scmp.eq.s32.totalorder %s336_s21, 0  ;;  %p350_p2 = scmp.eq.s32.totalorder %s1874_s17, 1 }
   0xb   : > { %p355_p3 = scmp.ne.s32.totalorder %s1748_s30, %s1744_s29  ;;  %p356_p4 = scmp.eq.s32.totalorder %s1407_s18, 1 }
   0xc   : > { %s1889_s22 = scalar_select %p337_p1, %s1752_s15, %s339_s20  }
   0xd   : > { %p1891_p5 = por %p350_p2, %p349_p0  ;;  %p1895_p6 = por %p356_p4, %p355_p3 }
   0xe   : > { %2163 = sst [smem:[#allocation11_spill]] %s1889_s22  ;;  %p1408_p7 = scmp.ge.s32.totalorder %s1756_s16, 1 }
   0xf   : > { %s2164_s23 = scalar_select %p1891_p5, 1, 0 }
  0x10   : > { %s2165_s24 = scalar_select %p1895_p6, 1, 0 }
  0x11   : > { %p363_p8 = scmp.lt.s32.totalorder %s1756_s16, 3  ;;  %p2157_p9 = scmp.eq.s32.totalorder %s1874_s17, 0 }
  0x12   : > { %2166 = sst [smem:[#allocation12_spill]] %s2165_s24  ;;  %s1758_s26 = smov [#allocation3]  }
  0x13   : > { %p1902_p10 = pnand %p1408_p7, %p363_p8  ;;  %s393_s27 = sshll.u32 %s1758_s26, 4  ;;  %s394_s27 = int_to_ptr.vmem [resolvable:$true] %s393_s27 }
  0x14   : > { %s1662_s21 = scalar_lea.hbm %s2146_s8, 256 }
  0x15   : > { %s2167_s25 = scalar_select %p1902_p10, 1, 0 }
  0x16   : > { %p1570_p11 = pneg %p1902_p10  ;;  %p1663_p13 = scmp.ne.s32.totalorder %s2146_s8, %s1662_s21 }
  0x17   : > { %p1669_p3 = scmp.lt.u32.totalorder %s1662_s21, %s2146_s8 }
  0x18   : > { %p1910_p12 = pnand %p2157_p9, %p1570_p11 }
  0x1a   : > { %p1664_p0 = pneg %p1910_p12 }
  0x1c   : > { %p1665_p1 = pnand %p1664_p0, %p1663_p13 }
  0x1e   : > { %p1666_p2 = pneg %p1665_p1 }
  0x20   : > { %p1671_p4 = pnand %p1669_p3, %p1666_p2 }
  0x22   : > { %1674 = shalt.err (!%p1671_p4)
}
  0x23   : > { %s1675_s24 = scalar_lea.vmem %s394_s27, 256  ;;  %p1683_p9 = scmp.lt.s32.totalorder %s394_s27, %s394_s27 }
  0x24   : > { %p1676_p7 = scmp.ne.s32.totalorder %s394_s27, %s1675_s24  ;;  %p1684_p6 = scmp.lt.s32.totalorder %s1675_s24, %s1675_s24 }
  0x26   : > { %p1678_p8 = pnand %p1676_p7, %p1664_p0  ;;  %p1685_p5 = por %p1684_p6, %p1683_p9 }
  0x28   : > { %p1679_p11 = pneg %p1678_p8 }
  0x2a   : > { %p1686_p10 = pnand %p1685_p5, %p1679_p11 }
  0x2c   : > { %1689 = shalt.err (!%p1686_p10)
}
  0x2d   : > { %s1759_s15 = smov 64   ;;  %s1760_s22 = smov 4  }
  0x2e   : > { %1573 = dma.hbm_to_vmem [thread:$0]  (!%p1910_p12), %s2146_s8, 256, %s394_s27, [#allocation4], %s1759_s15, %s1759_s15, %s1760_s22  }
  0x2f   : > { %p2169_p13 = scmp.ne.s32.totalorder %s2167_s25, 0 }
  0x30   : > { %p2170_p1 = scmp.eq.s32.totalorder (!%p2169_p13), %s1874_s17, 0 }
  0x31   : > { %437 = sbr.rel (%p2169_p13) target bundleno = 2628 (0xa44), region = 76 }
  0x38   : > { %1735 = dma.done.wait (%p2170_p1), [#allocation4], 256   ;;  %p2171_p0 = pmov %p2170_p1 }
  0x39   : > { %p485_p5 = scmp.lt.s32.totalorder %s1874_s17, 1  ;;  %v1761_v0 = vmov 0.0   ;;  %vm1762_vm0 = vmmov 0   ;;  %s2172_s0 = sld [smem:[#allocation13_spill]]  ;;  %v1632_v1 = vld [vmem:[%s2140_s2] sm:$0xff]   ;;  %v1633_v2 = vld [vmem:[%s2140_s2 + $0x8] sm:$0xff]   ;;  %v567_v23 = vlaneseq }
  0x3a   : > { %1737 = vsyncadd (%p2171_p0), [#allocation4], 4294967040  ;;  %1480 = vmatprep.subr.bf16.mxu0 %v1761_v0  ;;  %1484 = vmatprep.mubr.msk.bf16.mxu0 %vm1762_vm0, %v1761_v0  ;;  %vm521_vm1 = vcmask 261120   ;;  %v1416_v5 = vld [vmem:[%s2141_s3] ss:$0 sm:$0xff]  ;;  %s1764_s25 = smov 96  }
  0x3b   : > { %s1941_s19 = scalar_select %p485_p5, %s1874_s17, 1  ;;  %1488 = vmatprep.subr.bf16.mxu1 %v1761_v0  ;;  %1490 = vmatprep.mubr.msk.bf16.mxu1 %vm1762_vm0, %v1761_v0  ;;  %vm575_vm2 = vcmask 64512   ;;  %v568_v26 = vshrl.u32 %v567_v23, 7  ;;  %vm639_vm3 = vcmask 1043456   ;;  %vm1026_vm4 = vcmask 130048  }
  0x3c   : > { %1481 = vmatpush3.bf16.msra.mxu0 %v1632_v1  ;;  %s1765_s27 = smov 80   ;;  %s1767_s21 = smov 72   ;;  %vm1028_vm5 = vcmask 195584   ;;  %vm1238_vm6 = vcmask 523264  }
  0x3d   : > { %s1414_s24 = sshll.u32 %s1941_s19, 3  ;;  %1482 = vmatprep.subr.bf16.mxu0 %v1761_v0  ;;  %s1768_s26 = smov 112   ;;  %v569_v28 = vsub.s32 0, %v568_v26 }
  0x3e   : > { %s1769_s15 = smov 104   ;;  %s491_s20 = scalar_lea.vmem %s2139_s1, %s1941_s19 }
  0x3f   : > { %s488_s28 = scalar_lea.vmem %s2172_s0, %s1414_s24  ;;  %s1763_s24 = smov 120   ;;  %v494_v24 = vld [vmem:[%s491_s20] sm:$0x1] }
  0x40   : > { %v1956_v3 = vld [vmem:[%s488_s28] sm:$0xff]  ;;  %1483 = vmatpush3.bf16.msra.mxu0 %v1633_v2  ;;  %s1766_s28 = smov 88   ;;  %v1415_v25 = vadd.f32 -1.0, %v494_v24  ;;  %s1770_s19 = smov 56  }
  0x41   : > { %v497_v4 = vpack.c.bf16 %v1956_v3, %v1956_v3  ;;  %1494 = vmatprep.subr.bf16.mxu0 %v1761_v0  ;;  %s1775_s18 = smov 16   ;;  %s1776_s20 = smov 24  }
  0x42   : > { %v496_v27 = vmul.f32 1e+09, %v1415_v25  ;;  %p2173_p9 = scmp.ne.s32.totalorder %s2164_s23, 0 }
  0x43   : > { %1485 = vmatmul.mubr.msk.bf16.vlgmr.msra.gmra.mrb[0].mxu0 %vm521_vm1, %v497_v4 }
  0x44   : > { %1496 = vmatprep.mubr.msk.bf16.mxu0 %vm1762_vm0, %v1761_v0  ;;  %v570_v29 = vrot.slane %v496_v27, %v569_v28 }
 0x116   : > { %v559_v6 = vpop.f32.mrb[0].mxu0 }
 0x117   : > { %v560_v7 = vadd.f32 %v1416_v5, %v559_v6  ;;  %v1486_v8 = vpop.f32.mrb[1].mxu0 }
 0x118   : > { %v562_v9 = vpop.f32.mrb[2].mxu0 }
 0x119   : > { %v1968_v10 = vpack.c.bf16 %v560_v7, %v560_v7  ;;  %v1487_v11 = vpop.f32.mrb[3].mxu0 }
 0x11b   : > { %683 = vrot.lane.b32.xlu1 %v1968_v10, %s1763_s24  ;;  %573 = vrot.lane.b32.xlu0 %v1968_v10, %s1764_s25  ;;  %s1771_s24 = smov 64   ;;  %s1772_s25 = smov 40  }
 0x11f   : > { %795 = vrot.lane.b32.xlu1 %v1968_v10, %s1765_s27  ;;  %685 = vrot.lane.b32.xlu0 %v1968_v10, %s1766_s28  ;;  %s1773_s27 = smov 48   ;;  %s1774_s28 = smov 8  }
 0x123   : > { %905 = vrot.lane.b32.xlu1 %v1968_v10, %s1767_s21  ;;  %793 = vrot.lane.b32.xlu0 %v1968_v10, %s1768_s26 }
 0x127   : > { %903 = vrot.lane.b32.xlu0 %v1968_v10, %s1769_s15  ;;  %s482_s15 = sand.u32 1, %s1748_s30  }
 0x128   : > { %s1413_s22 = sshll.u32 %s482_s15, 3 }
 0x18d   : > { %v574_v12 = vpop.permute.xlu0 %573  ;;  %v684_v15 = vpop.permute.xlu1 %683 }
 0x18e   : > { %v580_v13 = vsel %vm575_vm2, %v574_v12, 0 }
 0x18f   : > { %1489 = vmatpush3.bf16.xpose.msra.mxu1 %v580_v13 }
 0x190   : > { %1500 = vmatprep.subr.bf16.mxu1 %v1761_v0 }
 0x191   : > { %v686_v14 = vpop.permute.xlu0 %685  ;;  %v796_v17 = vpop.permute.xlu1 %795 }
 0x192   : > { %v691_v16 = vsel %vm575_vm2, %v686_v14, 0  ;;  %v801_v18 = vsel %vm575_vm2, %v796_v17, 0 }
 0x195   : > { %v906_v19 = vpop.permute.xlu1 %905  ;;  %v794_v20 = vpop.permute.xlu0 %793 }
 0x196   : > { %1491 = vmatmul.mubr.msk.bf16.vlgmr.msra.gmra.mrb[0].mxu1 %vm575_vm2, %v1968_v10  ;;  %v911_v21 = vsel %vm575_vm2, %v906_v19, 0 }
 0x197   : > { %1501 = vmatpush3.bf16.xpose.msra.mxu1 %v691_v16  ;;  %1502 = vmatprep.mubr.msk.bf16.mxu1 %vm1762_vm0, %v1761_v0 }
 0x198   : > { %1512 = vmatprep.subr.bf16.mxu1 %v1761_v0 }
 0x199   : > { %v904_v22 = vpop.permute.xlu0 %903 }
 0x19e   : > { %1503 = vmatmul.mubr.msk.bf16.vlgmr.msra.gmra.mrb[4].mxu1 %vm575_vm2, %v684_v15 }
 0x19f   : > { %1513 = vmatpush3.bf16.xpose.msra.mxu1 %v801_v18  ;;  %1514 = vmatprep.mubr.msk.bf16.mxu1 %vm1762_vm0, %v1761_v0 }
 0x1a0   : > { %1524 = vmatprep.subr.bf16.mxu1 %v1761_v0 }
 0x1a6   : > { %1515 = vmatmul.mubr.msk.bf16.vlgmr.msra.gmra.mrb[8].mxu1 %vm575_vm2, %v794_v20 }
 0x1a7   : > { %1525 = vmatpush3.bf16.xpose.msra.mxu1 %v911_v21  ;;  %1526 = vmatprep.mubr.msk.bf16.mxu1 %vm1762_vm0, %v1761_v0 }
 0x1a8   : > { %1536 = vmatprep.subr.bf16.mxu1 %v1761_v0 }
 0x1ae   : > { %1527 = vmatmul.mubr.msk.bf16.vlgmr.msra.gmra.mrb[12].mxu1 %vm575_vm2, %v904_v22 }
 0x1af   : > { %1540 = vmatprep.mubr.msk.bf16.mxu1 %vm1762_vm0, %v1761_v0 }
 0x269   : > { %v616_v30 = vpop.f32.mrb[0].mxu1 }
 0x26a   : > { %v617_v31 = vadd.f32 %v616_v30, %v570_v29  ;;  %v1492_v32 = vpop.f32.mrb[1].mxu1 }
 0x26b   : > { %v619_v33 = vpop.f32.mrb[2].mxu1 }
 0x26c   : > { %v1493_v34 = vpop.f32.mrb[3].mxu1  ;;  %v622_v35 = vsel %vm575_vm2, %v617_v31, -inf }
 0x26d   : > { %623 = vmax.xlane.f32.xlu1 %v622_v35 }
 0x271   : > { %v727_v36 = vpop.f32.mrb[4].mxu1 }
 0x272   : > { %v728_v37 = vadd.f32 %v727_v36, %v570_v29  ;;  %v1504_v38 = vpop.f32.mrb[5].mxu1 }
 0x273   : > { %v730_v39 = vpop.f32.mrb[6].mxu1 }
 0x274   : > { %v1505_v40 = vpop.f32.mrb[7].mxu1  ;;  %v733_v41 = vsel %vm575_vm2, %v728_v37, -inf }
 0x275   : > { %734 = vmax.xlane.f32.xlu0 %v733_v41 }
 0x279   : > { %v837_v42 = vpop.f32.mrb[8].mxu1 }
 0x27a   : > { %v838_v43 = vadd.f32 %v837_v42, %v570_v29  ;;  %v1516_v44 = vpop.f32.mrb[9].mxu1 }
 0x27b   : > { %v840_v45 = vpop.f32.mrb[10].mxu1  ;;  %v1634_v44 = vld [vmem:[%s2142_s4] sm:$0xff]  }
 0x27c   : > { %v1517_v46 = vpop.f32.mrb[11].mxu1  ;;  %v843_v47 = vsel %vm575_vm2, %v838_v43, -inf  ;;  %1537 = vmatpush3.bf16.msra.mxu1 %v1634_v44  ;;  %v1635_v45 = vld [vmem:[%s2142_s4 + $0x8] sm:$0xff]  }
 0x27d   : > { %844 = vmax.xlane.f32.xlu0 %v843_v47  ;;  %1538 = vmatprep.subr.bf16.mxu1 %v1761_v0 }
 0x280   : > { %1539 = vmatpush3.bf16.msra.mxu1 %v1635_v45 }
 0x281   : > { %v947_v48 = vpop.f32.mrb[12].mxu1  ;;  %1552 = vmatprep.subr.bf16.mxu1 %v1761_v0 }
 0x282   : > { %v948_v49 = vadd.f32 %v947_v48, %v570_v29  ;;  %v1528_v50 = vpop.f32.mrb[13].mxu1 }
 0x283   : > { %v950_v51 = vpop.f32.mrb[14].mxu1 }
 0x284   : > { %v1529_v52 = vpop.f32.mrb[15].mxu1  ;;  %v953_v53 = vsel %vm575_vm2, %v948_v49, -inf }
 0x285   : > { %954 = vmax.xlane.f32.xlu1 %v953_v53 }
 0x2fa   : > { %v624_v54 = vpop.xlane.xlu1 %623 }
 0x2fb   : > { %v625_v55 = vsub.f32 %v617_v31, %v624_v54 }
 0x2fd   : > { %v626_v56 = vmul.f32 1.442695, %v625_v55 }
 0x2ff   : > { %1642 = vpow2.f32 %v626_v56 }
 0x302   : > { %v735_v57 = vpop.xlane.xlu0 %734 }
 0x303   : > { %v736_v58 = vsub.f32 %v728_v37, %v735_v57 }
 0x305   : > { %v737_v59 = vmul.f32 1.442695, %v736_v58 }
 0x307   : > { %1644 = vpow2.f32 %v737_v59 }
 0x309   : > { %v1643_v60 = vpop.eup %1642 }
 0x30a   : > { %v845_v61 = vpop.xlane.xlu0 %844  ;;  %v628_v62 = vsel %vm575_vm2, %v1643_v60, 0.0 }
 0x30b   : > { %v846_v63 = vsub.f32 %v838_v43, %v845_v61  ;;  %629 = vadd.xlane.f32.xlu0 %v628_v62  ;;  %v1428_v62 = vld [vmem:[%s2143_s5] ss:$0 sm:$0xff] }
 0x30d   : > { %v847_v1 = vmul.f32 1.442695, %v846_v63 }
 0x30f   : > { %1646 = vpow2.f32 %v847_v1 }
 0x311   : > { %v1645_v2 = vpop.eup %1644 }
 0x312   : > { %v739_v4 = vsel %vm575_vm2, %v1645_v2, 0.0  ;;  %v955_v7 = vpop.xlane.xlu1 %954 }
 0x313   : > { %740 = vadd.xlane.f32.xlu1 %v739_v4  ;;  %v956_v8 = vsub.f32 %v948_v49, %v955_v7 }
 0x315   : > { %v957_v9 = vmul.f32 1.442695, %v956_v8 }
 0x317   : > { %1648 = vpow2.f32 %v957_v9 }
 0x319   : > { %v1647_v5 = vpop.eup %1646 }
 0x31a   : > { %v849_v6 = vsel %vm575_vm2, %v1647_v5, 0.0 }
 0x31b   : > { %850 = vadd.xlane.f32.xlu0 %v849_v6 }
 0x321   : > { %v1649_v11 = vpop.eup %1648 }
 0x322   : > { %v959_v12 = vsel %vm575_vm2, %v1649_v11, 0.0 }
 0x324   : > { %745 = vrot.lane.b32.xlu1 %v1968_v10, %s1770_s19 }
 0x331   : > { %634 = vrot.lane.b32.xlu0 %v1968_v10, %s1771_s24 }
 0x335   : > { %965 = vrot.lane.b32.xlu0 %v1968_v10, %s1772_s25  ;;  %s1447_s25 = sshll.u32 %s1874_s17, 7  ;;  %s1777_s17 = smov [#allocation6]  }
 0x336   : > { %s2095_s0 = scalar_lea.hbm %s2152_s14, %s1447_s25 }
 0x348   : > { %960 = vadd.xlane.f32.xlu1 %v959_v12 }
 0x359   : > { %855 = vrot.lane.b32.xlu1 %v1968_v10, %s1773_s27  ;;  %s484_s27 = scalar_lea.vmem [#allocation6], %s1413_s22  ;;  %s1694_s22 = sshll.u32 %s1777_s17, 4  ;;  %s1695_s22 = int_to_ptr.vmem [resolvable:$false] %s1694_s22 }
 0x35a   : > { %s1696_s19 = scalar_lea.vmem %s1695_s22, 256 }
 0x398   : > { %v630_v13 = vpop.xlane.xlu0 %629 }
 0x399   : > { %1650 = vrcp.f32 %v630_v13 }
 0x3a0   : > { %v741_v14 = vpop.xlane.xlu1 %740 }
 0x3a1   : > { %1652 = vrcp.f32 %v741_v14  ;;  %v1636_v14 = vld [vmem:[#allocation3] sm:$0xff]  }
 0x3a3   : > { %v1651_v15 = vpop.eup %1650 }
 0x3a4   : > { %v632_v17 = vmul.f32 %v1651_v15, %v1643_v60  ;;  %v746_v20 = vpop.permute.xlu1 %745  ;;  %v1637_v15 = vld [vmem:[#allocation3 + $0x8] sm:$0xff]  }
 0x3a5   : > { %v751_v23 = vsel %vm639_vm3, %v746_v20, 0 }
 0x3a6   : > { %v633_v21 = vpack.c.bf16 %v632_v17, %v632_v17 }
 0x3a8   : > { %v851_v16 = vpop.xlane.xlu0 %850 }
 0x3a9   : > { %1654 = vrcp.f32 %v851_v16  ;;  %v1639_v16 = vld [vmem:[%s2148_s10 + $0x8] sm:$0xff]  }
 0x3ab   : > { %v1653_v22 = vpop.eup %1652 }
 0x3ac   : > { %v635_v18 = vpop.permute.xlu0 %634  ;;  %v743_v10 = vmul.f32 %v1653_v22, %v1645_v2 }
 0x3ad   : > { %v641_v19 = vsel %vm639_vm3, %v635_v18, 0 }
 0x3ae   : > { %1495 = vmatpush3.bf16.msra.mxu0 %v641_v19  ;;  %v744_v24 = vpack.c.bf16 %v743_v10, %v743_v10 }
 0x3af   : > { %1506 = vmatprep.subr.bf16.mxu0 %v1761_v0 }
 0x3b0   : > { %v966_v30 = vpop.permute.xlu0 %965 }
 0x3b1   : > { %1497 = vmatmul.mubr.msk.bf16.vlgmr.msra.gmra.mrb[4].mxu0 %vm575_vm2, %v633_v21  ;;  %v971_v32 = vsel %vm639_vm3, %v966_v30, 0  ;;  %v1432_v21 = vld [vmem:[%s2144_s6] ss:$0 sm:$0xff] }
 0x3b2   : > { %1507 = vmatpush3.bf16.msra.mxu0 %v751_v23  ;;  %1508 = vmatprep.mubr.msk.bf16.mxu0 %vm1762_vm0, %v1761_v0  ;;  %v1433_v23 = vld [vmem:[%s2145_s7] ss:$0 sm:$0xff] }
 0x3b3   : > { %1518 = vmatprep.subr.bf16.mxu0 %v1761_v0  ;;  %v1655_v25 = vpop.eup %1654 }
 0x3b4   : > { %v853_v27 = vmul.f32 %v1655_v25, %v1647_v5 }
 0x3b6   : > { %v854_v31 = vpack.c.bf16 %v853_v27, %v853_v27  ;;  %v1641_v27 = vld [vmem:[%s2148_s10 + $0x18] sm:$0xff]  }
 0x3b9   : > { %1509 = vmatmul.mubr.msk.bf16.vlgmr.msra.gmra.mrb[8].mxu0 %vm575_vm2, %v744_v24 }
 0x3ba   : > { %1520 = vmatprep.mubr.msk.bf16.mxu0 %vm1762_vm0, %v1761_v0 }
 0x3d5   : > { %v961_v26 = vpop.xlane.xlu1 %960 }
 0x3d6   : > { %1656 = vrcp.f32 %v961_v26  ;;  %v1640_v26 = vld [vmem:[%s2148_s10 + $0x10] sm:$0xff]  }
 0x3d9   : > { %v856_v28 = vpop.permute.xlu1 %855 }
 0x3da   : > { %v861_v29 = vsel %vm639_vm3, %v856_v28, 0  ;;  %v1434_v28 = vld [vmem:[%s2147_s9] ss:$0 sm:$0xff] }
 0x3db   : > { %1519 = vmatpush3.bf16.msra.mxu0 %v861_v29 }
 0x3dc   : > { %1530 = vmatprep.subr.bf16.mxu0 %v1761_v0 }
 0x3de   : > { %1521 = vmatmul.mubr.msk.bf16.vlgmr.msra.gmra.mrb[12].mxu0 %vm575_vm2, %v854_v31 }
 0x3df   : > { %1531 = vmatpush3.bf16.msra.mxu0 %v971_v32  ;;  %1532 = vmatprep.mubr.msk.bf16.mxu0 %vm1762_vm0, %v1761_v0 }
 0x3e0   : > { %v1657_v33 = vpop.eup %1656  ;;  %1544 = vmatprep.subr.bf16.mxu0 %v1761_v0 }
 0x3e1   : > { %v963_v34 = vmul.f32 %v1657_v33, %v1649_v11 }
 0x3e3   : > { %v964_v35 = vpack.c.bf16 %v963_v34, %v963_v34 }
 0x3e6   : > { %1533 = vmatmul.mubr.msk.bf16.vlgmr.msra.gmra.mrb[16].mxu0 %vm575_vm2, %v964_v35 }
 0x3e7   : > { %1548 = vmatprep.mubr.msk.bf16.mxu0 %vm1762_vm0, %v1761_v0  ;;  %1545 = vmatpush3.bf16.msra.mxu0 %v1636_v14 }
 0x3e8   : > { %1546 = vmatprep.subr.bf16.mxu0 %v1761_v0 }
 0x3eb   : > { %1547 = vmatpush3.bf16.msra.mxu0 %v1637_v15 }
 0x484   : > { %v677_v36 = vpop.f32.mrb[4].mxu0 }
 0x485   : > { %v1498_v37 = vpop.f32.mrb[5].mxu0 }
 0x486   : > { %v680_v38 = vpop.f32.mrb[6].mxu0 }
 0x487   : > { %v1499_v39 = vpop.f32.mrb[7].mxu0 }
 0x48c   : > { %v787_v40 = vpop.f32.mrb[8].mxu0 }
 0x48d   : > { %1014 = vrot.lane.b32.xlu1 %v787_v40, %s1774_s28  ;;  %v1510_v41 = vpop.f32.mrb[9].mxu0  ;;  %s1327_s28 = sshll.u32 %s484_s27, 4  ;;  %s2097_s28 = int_to_ptr.vmem [resolvable:$true] %s1327_s28 }
 0x48e   : > { %v790_v42 = vpop.f32.mrb[10].mxu0  ;;  %p1697_p2 = scmp.lt.s32.totalorder %s2097_s28, %s1695_s22 }
 0x48f   : > { %v1511_v43 = vpop.f32.mrb[11].mxu0 }
 0x4b1   : > { %v897_v46 = vpop.f32.mrb[12].mxu0 }
 0x4b2   : > { %1018 = vrot.lane.b32.xlu0 %v897_v46, %s1775_s18  ;;  %v1522_v47 = vpop.f32.mrb[13].mxu0  ;;  %s1314_s18 = scalar_lea.sflag [#allocation5], %s482_s15 }
 0x4b3   : > { %v900_v48 = vpop.f32.mrb[14].mxu0 }
 0x4b4   : > { %v1523_v49 = vpop.f32.mrb[15].mxu0 }
 0x4b9   : > { %v1007_v50 = vpop.f32.mrb[16].mxu0 }
 0x4ba   : > { %1022 = vrot.lane.b32.xlu1 %v1007_v50, %s1776_s20  ;;  %v1534_v51 = vpop.f32.mrb[17].mxu0  ;;  %s1690_s20 = scalar_lea.vmem %s2097_s28, 128 }
 0x4bb   : > { %v1010_v52 = vpop.f32.mrb[18].mxu0  ;;  %p1691_p6 = scmp.ne.s32.totalorder %s2097_s28, %s1690_s20  ;;  %p1698_p3 = scmp.lt.s32.totalorder %s1696_s19, %s1690_s20 }
 0x4bc   : > { %v1535_v53 = vpop.f32.mrb[19].mxu0  ;;  %v1444_v52 = vld [vmem:[%s2150_s12] ss:$0 sm:$0xff] }
 0x4bd   : > { %p1692_p10 = pnand %p1691_p6, %p2173_p9  ;;  %p1699_p4 = por %p1698_p3, %p1697_p2 }
 0x4bf   : > { %p1693_p12 = pneg %p1692_p10 }
 0x4c1   : > { %p1700_p7 = pnand %p1699_p4, %p1693_p12 }
 0x4ff   : > { %v1015_v54 = vpop.permute.xlu1 %1014 }
 0x500   : > { %v1025_v56 = vsel %vm575_vm2, %v677_v36, %v1015_v54  ;;  %v1445_v54 = vld [vmem:[%s2151_s13] ss:$0 sm:$0xff] }
 0x524   : > { %v1019_v55 = vpop.permute.xlu0 %1018 }
 0x525   : > { %v1027_v57 = vsel %vm1026_vm4, %v1025_v56, %v1019_v55 }
 0x52c   : > { %v1023_v58 = vpop.permute.xlu1 %1022 }
 0x52d   : > { %v1029_v59 = vsel %vm1028_vm5, %v1027_v57, %v1023_v58 }
 0x52e   : > { %1030 = vst.msk [vmem:[#allocation2] sm:$0xff] %vm521_vm1, %v1029_v59 }
 0x535   : > { %v1031_v60 = vld [vmem:[#allocation2] sm:$0xff] }
 0x536   : > { %v1032_v61 = vpack.c.bf16 %v1031_v60, %v1031_v60 }
 0x538   : > { %1541 = vmatmul.mubr.msk.bf16.vlgmr.msra.gmra.mrb[16].mxu1 %vm521_vm1, %v1032_v61 }
 0x539   : > { %1560 = vmatprep.mubr.msk.bf16.mxu1 %vm1762_vm0, %v1761_v0 }
 0x60b   : > { %v1093_v63 = vpop.f32.mrb[16].mxu1 }
 0x60c   : > { %v1094_v1 = vadd.f32 %v1428_v62, %v1093_v63  ;;  %v1542_v2 = vpop.f32.mrb[17].mxu1 }
 0x60d   : > { %v1096_v4 = vpop.f32.mrb[18].mxu1 }
 0x60e   : > { %v1543_v5 = vpop.f32.mrb[19].mxu1  ;;  %v1099_v6 = vadd.f32 %v1094_v1, %v1956_v3  ;;  %v1638_v3 = vld [vmem:[%s2148_s10] sm:$0xff]  }
 0x60f   : > { %1553 = vmatpush3.bf16.msra.mxu1 %v1638_v3 }
 0x610   : > { %v1102_v7 = vsel %vm521_vm1, %v1099_v6, 0.0  ;;  %1554 = vmatprep.subr.bf16.mxu1 %v1761_v0 }
 0x611   : > { %1103 = vadd.xlane.f32.xlu0 %v1102_v7 }
 0x613   : > { %1555 = vmatpush3.bf16.msra.mxu1 %v1639_v16 }
 0x614   : > { %1556 = vmatprep.subr.bf16.mxu1 %v1761_v0 }
 0x617   : > { %1557 = vmatpush3.bf16.msra.mxu1 %v1640_v26 }
 0x618   : > { %1558 = vmatprep.subr.bf16.mxu1 %v1761_v0  ;;  %v1438_v0 = vld [vmem:[%s2149_s11] ss:$0 sm:$0xff] }
 0x61b   : > { %1559 = vmatpush3.bf16.msra.mxu1 %v1641_v27 }
 0x69e   : > { %v1104_v8 = vpop.xlane.xlu0 %1103 }
 0x69f   : > { %v1106_v9 = vmul.f32 0.03125, %v1104_v8 }
 0x6a1   : > { %v1107_v11 = vsub.f32 %v1099_v6, %v1106_v9 }
 0x6a3   : > { %v1108_v12 = vmul.f32 %v1107_v11, %v1107_v11 }
 0x6a5   : > { %v1109_v13 = vsel %vm521_vm1, %v1108_v12, 0.0 }
 0x6a6   : > { %1110 = vadd.xlane.f32.xlu1 %v1109_v13 }
 0x733   : > { %v1111_v17 = vpop.xlane.xlu1 %1110 }
 0x734   : > { %v1112_v18 = vmul.f32 0.03125, %v1111_v17 }
 0x736   : > { %v1113_v19 = vadd.f32 1e-05, %v1112_v18 }
 0x738   : > { %1658 = vrsqrt.f32 %v1113_v19 }
 0x742   : > { %v1659_v20 = vpop.eup %1658 }
 0x743   : > { %v1115_v22 = vmul.f32 %v1659_v20, %v1107_v11 }
 0x745   : > { %v1122_v10 = vmul.f32 %v1432_v21, %v1115_v22 }
 0x747   : > { %v1129_v24 = vadd.f32 %v1433_v23, %v1122_v10 }
 0x749   : > { %v1130_v25 = vpack.c.bf16 %v1129_v24, %v1129_v24 }
 0x74b   : > { %1549 = vmatmul.mubr.msk.bf16.vlgmr.msra.gmra.mrb[20].mxu0 %vm521_vm1, %v1130_v25 }
 0x81e   : > { %v1191_v29 = vpop.f32.mrb[20].mxu0 }
 0x81f   : > { %v1192_v30 = vadd.f32 %v1434_v28, %v1191_v29  ;;  %v1550_v31 = vpop.f32.mrb[21].mxu0 }
 0x820   : > { %v1194_v32 = vpop.f32.mrb[22].mxu0 }
 0x821   : > { %v1197_v33 = vmax.f32 %v1192_v30, 0.0  ;;  %v1551_v34 = vpop.f32.mrb[23].mxu0 }
 0x823   : > { %v1198_v35 = vpack.c.bf16 %v1197_v33, %v1197_v33 }
 0x825   : > { %1561 = vmatmul.mubr.msk.bf16.vlgmr.msra.gmra.mrb[20].mxu1 %vm1238_vm6, %v1198_v35 }
 0x8f8   : > { %v1276_v36 = vpop.f32.mrb[20].mxu1 }
 0x8f9   : > { %v1277_v37 = vadd.f32 %v1438_v0, %v1276_v36  ;;  %v1562_v38 = vpop.f32.mrb[21].mxu1 }
 0x8fa   : > { %v1279_v39 = vpop.f32.mrb[22].mxu1 }
 0x8fb   : > { %v1563_v40 = vpop.f32.mrb[23].mxu1  ;;  %v1282_v41 = vadd.f32 %v1277_v37, %v1129_v24 }
 0x8fd   : > { %v1285_v42 = vsel %vm521_vm1, %v1282_v41, 0.0 }
 0x8fe   : > { %1286 = vadd.xlane.f32.xlu0 %v1285_v42 }
 0x98b   : > { %v1287_v43 = vpop.xlane.xlu0 %1286 }
 0x98c   : > { %v1288_v44 = vmul.f32 0.03125, %v1287_v43 }
 0x98e   : > { %v1289_v45 = vsub.f32 %v1282_v41, %v1288_v44 }
 0x990   : > { %v1290_v46 = vmul.f32 %v1289_v45, %v1289_v45 }
 0x992   : > { %v1291_v47 = vsel %vm521_vm1, %v1290_v46, 0.0 }
 0x993   : > { %1292 = vadd.xlane.f32.xlu0 %v1291_v47 }
 0xa20   : > { %v1293_v48 = vpop.xlane.xlu0 %1292 }
 0xa21   : > { %v1294_v49 = vmul.f32 0.03125, %v1293_v48 }
 0xa23   : > { %v1295_v50 = vadd.f32 1e-05, %v1294_v49 }
 0xa25   : > { %1660 = vrsqrt.f32 %v1295_v50 }
 0xa2f   : > { %v1661_v51 = vpop.eup %1660 }
 0xa30   : > { %v1297_v53 = vmul.f32 %v1661_v51, %v1289_v45 }
 0xa32   : > { %v1304_v55 = vmul.f32 %v1444_v52, %v1297_v53 }
 0xa34   : > { %v1311_v56 = vadd.f32 %v1445_v54, %v1304_v55 }
 0xa36   : > { %1312 = vst.msk [vmem:[%s484_s27] sm:$0xff] %vm521_vm1, %v1311_v56 }
 0xa37   : > { %1703 = shalt.err (!%p1700_p7)
}
 0xa38   : > { %s1704_s15 = scalar_lea.hbm %s2095_s0, 128  ;;  %s1708_s27 = scalar_lea.hbm %s2152_s14, 256 }
 0xa39   : > { %p1705_p8 = scmp.ne.s32.totalorder %s2095_s0, %s1704_s15  ;;  %p1709_p1 = scmp.lt.u32.totalorder %s2095_s0, %s2152_s14 }
 0xa3a   : > { %p1710_p0 = scmp.lt.u32.totalorder %s1708_s27, %s1704_s15  ;;  %p1712_p6 = scmp.lt.u32.totalorder %s1704_s15, %s2095_s0 }
 0xa3b   : > { %p1706_p11 = pnand %p1705_p8, %p2173_p9 }
 0xa3c   : > { %p1711_p5 = por %p1710_p0, %p1709_p1 }
 0xa3d   : > { %p1707_p13 = pneg %p1706_p11 }
 0xa3e   : > { %p1713_p10 = por %p1712_p6, %p1711_p5 }
 0xa40   : > { %p1714_p12 = pnand %p1713_p10, %p1707_p13 }
 0xa42   : > { %1717 = shalt.err (!%p1714_p12)
}
 0xa43   : > { %1568 = dma.vmem_to_hbm [thread:$0]  (%p2173_p9), %s2097_s28, 128, %s2095_s0, %s1314_s18  }
 0xa44 PF: > { %s2174_s20 = sld [smem:[#allocation12_spill]]  ;;  %p1580_p2 = scmp.ge.s32.totalorder %s1756_s16, 2 }
 0xa45   : > { %s1339_s17 = sand.u32 1, %s1744_s29  }
 0xa46   : > { %s1340_s22 = scalar_lea.sflag [#allocation5], %s1339_s17 }
 0xa4a   : > { %p2175_p3 = scmp.ne.s32.totalorder %s2174_s20, 0 }
 0xa4c   : > { %p1575_p4 = pnand %p1580_p2, %p2175_p3 }
 0xa4e   : > { %1739 = dma.done.wait (!%p1575_p4), %s1340_s22, 128  }
 0xa4f   : > { %1741 = vsyncadd (!%p1575_p4), %s1340_s22, 4294967168  ;;  %s2176_s16 = sld [smem:[#allocation10_spill]]  ;;  %s2177_s19 = sld [smem:[#allocation9_spill]] }
 0xa50   : > { %s2178_s15 = sld [smem:[#allocation11_spill]]  ;;  %s2179_s29 = smov %s1748_s30 }
 0xa55   : > { %p25_p7 = scmp.ge.s32.totalorder %s2176_s16, 4   ;;  %s2180_s30 = smov %s2177_s19 }
 0xa57   :  { %27 = sbr.rel (!%p25_p7) target bundleno = 6 (0x6), region = 119 }
 0xa5e   :  { %1345 = vsyncpa [#allocation4], 1 }
 0xa5f   :  { %1347 = vsyncpa [#allocation4 + $0x1], 1 }
 0xa60   :  { %1348 = vsyncpa [#allocation5], 1 }
 0xa61   :  { %1350 = vsyncpa [#allocation5 + $0x1], 1 }

</bundles_post_ra>
